<compile_context>
chip_gen: v7x
topology: tpu7x:2x2x1
jax: 0.10.0
libtpu: 0.0.40
codegen_flags: <defaults>
</compile_context>

<pallas_src>
import math

import jax
import jax.numpy as jnp
from jax.experimental import pallas as pl
from jax.experimental.pallas import tpu as pltpu

# Module-consistent sizes (lane-dense on purpose).
B = 2                       # batch
N = 512                     # sequence / token count (M = B*N = 1024 rows)
DIM_IN = 128                # dim_in
DIM_HIDDEN_ARG = 64         # dim_hidden passed to the module ctor
DIM_HIDDEN = 2 * DIM_HIDDEN_ARG   # 128, module doubles it
DIM_OUT = DIM_IN            # default(dim_out, dim_in)
EPS = 1e-5                  # nn.LayerNorm default eps
TILE_M = 256                # rows per grid step


def _round_up(x, k):
    return ((x + k - 1) // k) * k


def _gelu_tanh(x):
    # TODO(synk): torch.nn.GELU default is the exact erf form; tanh approximation
    # used here (== GELU(approximate='tanh')) to guarantee clean Mosaic lowering.
    c = 0.7978845608028654  # sqrt(2/pi)
    return 0.5 * x * (1.0 + jnp.tanh(c * (x + 0.044715 * x * x * x)))


def _ffn_kernel(x_ref, w1_ref, w2_ref, bias_ref, out_ref):
    d_h = w1_ref.shape[1]
    d_out = w2_ref.shape[1]

    # --- Linear(dim_in, dim_hidden): bf16 operands, f32 accumulation ---------
    x = x_ref[...].astype(jnp.bfloat16)                               # (TM, D_IN)
    h = jnp.dot(x, w1_ref[...], preferred_element_type=jnp.float32)   # (TM, D_H) f32
    h = h + bias_ref[0:1, :d_h]

    # --- GELU (f32, EUP tanh) -------------------------------------------------
    h = _gelu_tanh(h)

    # --- LayerNorm (biased variance like torch.nn.LayerNorm). ----------------
    # gamma/beta are folded into W2 / b2 in the wrapper, so only the
    # normalization itself happens here.
    mu = jnp.mean(h, axis=-1, keepdims=True)
    var = jnp.mean((h - mu) ** 2, axis=-1, keepdims=True)
    hn = (h - mu) * jax.lax.rsqrt(var + EPS)

    # --- Linear(dim_hidden, dim_out), gamma/beta pre-folded -------------------
    out = jnp.dot(hn.astype(jnp.bfloat16), w2_ref[...],
                  preferred_element_type=jnp.float32)                 # (TM, D_OUT)
    out_ref[...] = out + bias_ref[1:2, :d_out]


def feedforward(x, w1, b1, gamma, beta, w2, b2, *, tile_m=TILE_M):
    """x: (..., dim_in) f32 -> (..., dim_out) f32.

    Weights are in (in, out) layout (an nn.Linear weight would be transposed
    once wrapper-side).
    """
    *batch_dims, d_in = x.shape
    d_h = w1.shape[1]
    d_out = w2.shape[1]
    m = int(math.prod(batch_dims))
    x2 = x.reshape(m, d_in)

    # Fold LayerNorm affine into the second linear (static weight fold, once).
    #   (hn * gamma + beta) @ W2 + b2 == hn @ (diag(gamma) @ W2) + (beta @ W2 + b2)
    w2_folded = gamma.reshape(d_h, 1).astype(jnp.float32) * w2.astype(jnp.float32)
    b2_folded = beta.reshape(1, d_h).astype(jnp.float32) @ w2.astype(jnp.float32) \
        + b2.reshape(1, d_out).astype(jnp.float32)

    # bf16 weights in HBM: MXU-native on v5e/v6e/v7x, half the weight DMA.
    w1_b = w1.astype(jnp.bfloat16)
    w2_b = w2_folded.astype(jnp.bfloat16)

    # Pack the two remaining bias vectors into one slab (single small DMA).
    width = max(d_h, d_out)
    bias = jnp.zeros((2, width), jnp.float32)
    bias = bias.at[0, :d_h].set(b1.reshape(-1).astype(jnp.float32))
    bias = bias.at[1, :d_out].set(b2_folded.reshape(-1))

    # Pad rows to a multiple of the tile (sublane multiple of 8).
    tm = min(tile_m, _round_up(m, 8))
    m_pad = _round_up(m, tm)
    if m_pad != m:
        x2 = jnp.pad(x2, ((0, m_pad - m), (0, 0)))

    out = pl.pallas_call(
        _ffn_kernel,
        out_shape=jax.ShapeDtypeStruct((m_pad, d_out), jnp.float32),
        grid=(m_pad // tm,),
        in_specs=[
            pl.BlockSpec((tm, d_in), lambda i: (i, 0)),       # x tile (pipelined)
            pl.BlockSpec((d_in, d_h), lambda i: (0, 0)),      # W1, VMEM-resident
            pl.BlockSpec((d_h, d_out), lambda i: (0, 0)),     # W2', VMEM-resident
            pl.BlockSpec((2, width), lambda i: (0, 0)),       # packed [b1; b2']
        ],
        out_specs=pl.BlockSpec((tm, d_out), lambda i: (i, 0)),
        compiler_params=pltpu.CompilerParams(
            dimension_semantics=("parallel",)),
    )(x2, w1_b, w2_b, bias)

    return out[:m].reshape(*batch_dims, d_out)


def _reference(x, w1, b1, gamma, beta, w2, b2):
    h = x @ w1 + b1
    h = _gelu_tanh(h)
    mu = h.mean(-1, keepdims=True)
    var = ((h - mu) ** 2).mean(-1, keepdims=True)
    hn = (h - mu) / jnp.sqrt(var + EPS) * gamma + beta
    return hn @ w2 + b2


if __name__ == "__main__":
    key = jax.random.PRNGKey(0)
    k_x, k_w1, k_b1, k_g, k_be, k_w2, k_b2 = jax.random.split(key, 7)

    x = jax.random.normal(k_x, (B, N, DIM_IN), dtype=jnp.float32)

    # Parameters (shapes follow the module; nn.Linear weights already in
    # (in, out) layout).
    w1 = jax.random.normal(k_w1, (DIM_IN, DIM_HIDDEN), jnp.float32) / jnp.sqrt(DIM_IN)
    b1 = 0.01 * jax.random.normal(k_b1, (DIM_HIDDEN,), jnp.float32)
    gamma = 1.0 + 0.1 * jax.random.normal(k_g, (DIM_HIDDEN,), jnp.float32)
    beta = 0.1 * jax.random.normal(k_be, (DIM_HIDDEN,), jnp.float32)
    w2 = jax.random.normal(k_w2, (DIM_HIDDEN, DIM_OUT), jnp.float32) / jnp.sqrt(DIM_HIDDEN)
    b2 = 0.01 * jax.random.normal(k_b2, (DIM_OUT,), jnp.float32)

    out = feedforward(x, w1, b1, gamma, beta, w2, b2)
    out = jax.block_until_ready(out)

    ref = _reference(x, w1, b1, gamma, beta, w2, b2)
    assert out.shape == (B, N, DIM_OUT), out.shape
    # bf16 MXU operands with f32 accumulation -> loosened tolerance vs f32 ref.
    assert jnp.allclose(out, ref, atol=5e-2, rtol=5e-2), \
        float(jnp.max(jnp.abs(out - ref)))

    print("KERNEL_OK")
</pallas_src>

<mosaic_0001>
module attributes {stable_mosaic.version = 11 : i64} {
  func.func @_ffn_kernel(%arg0: i32, %arg1: memref<256x128xf32, #tpu.memory_space<vmem>>, %arg2: memref<128x128xbf16, #tpu.memory_space<vmem>>, %arg3: memref<128x128xbf16, #tpu.memory_space<vmem>>, %arg4: memref<2x128xf32, #tpu.memory_space<vmem>>, %arg5: memref<256x128xf32, #tpu.memory_space<vmem>>) attributes {dimension_semantics = [#tpu.dimension_semantics<parallel>], iteration_bounds = array<i64: 4>, scalar_prefetch = 0 : i64, scratch_operands = 0 : i64, tpu.core_type = #tpu.core_type<tc>, window_params = [{transform_indices = @transform_0, window_bounds = array<i64: 256, 128>}, {pipeline_mode = #tpu.pipeline_mode<synchronous>, transform_indices = @transform_1, window_bounds = array<i64: 128, 128>}, {pipeline_mode = #tpu.pipeline_mode<synchronous>, transform_indices = @transform_2, window_bounds = array<i64: 128, 128>}, {pipeline_mode = #tpu.pipeline_mode<synchronous>, transform_indices = @transform_3, window_bounds = array<i64: 2, 128>}, {transform_indices = @transform_4, window_bounds = array<i64: 256, 128>}]} {
    %c0 = arith.constant 0 : index
    %c0_0 = arith.constant 0 : index
    %0 = vector.load %arg1[%c0, %c0_0] : memref<256x128xf32, #tpu.memory_space<vmem>>, vector<256x128xf32>
    %1 = arith.truncf %0 : vector<256x128xf32> to vector<256x128xbf16>
    %c0_1 = arith.constant 0 : index
    %c0_2 = arith.constant 0 : index
    %2 = vector.load %arg2[%c0_1, %c0_2] : memref<128x128xbf16, #tpu.memory_space<vmem>>, vector<128x128xbf16>
    %cst = arith.constant dense<0.000000e+00> : vector<256x128xf32>
    %3 = tpu.matmul %1, %2, %cst {dimension_numbers = #tpu.dot_dimension_numbers<[1], [0], [0], [1], [0, 0, 1, 1], [], []>} : vector<256x128xbf16>, vector<128x128xbf16>, vector<256x128xf32> -> vector<256x128xf32>
    %c0_3 = arith.constant 0 : index
    %c0_4 = arith.constant 0 : index
    %4 = vector.load %arg4[%c0_3, %c0_4] : memref<2x128xf32, #tpu.memory_space<vmem>>, vector<1x128xf32>
    %5 = vector.broadcast %4 : vector<1x128xf32> to vector<256x128xf32>
    %6 = arith.addf %3, %5 : vector<256x128xf32>
    %cst_5 = arith.constant 5.000000e-01 : f32
    %7 = vector.broadcast %cst_5 : f32 to vector<256x128xf32>
    %8 = arith.mulf %7, %6 : vector<256x128xf32>
    %cst_6 = arith.constant 4.471500e-02 : f32
    %9 = vector.broadcast %cst_6 : f32 to vector<256x128xf32>
    %10 = arith.mulf %9, %6 : vector<256x128xf32>
    %11 = arith.mulf %10, %6 : vector<256x128xf32>
    %12 = arith.mulf %11, %6 : vector<256x128xf32>
    %13 = arith.addf %6, %12 : vector<256x128xf32>
    %cst_7 = arith.constant 0.797884583 : f32
    %14 = vector.broadcast %cst_7 : f32 to vector<256x128xf32>
    %15 = arith.mulf %14, %13 : vector<256x128xf32>
    %16 = math.tanh %15 : vector<256x128xf32>
    %cst_8 = arith.constant 1.000000e+00 : f32
    %17 = vector.broadcast %cst_8 : f32 to vector<256x128xf32>
    %18 = arith.addf %17, %16 : vector<256x128xf32>
    %19 = arith.mulf %8, %18 : vector<256x128xf32>
    %cst_9 = arith.constant dense<0.000000e+00> : vector<256xf32>
    %20 = vector.multi_reduction <add>, %19, %cst_9 [1] : vector<256x128xf32> to vector<256xf32>
    %21 = vector.shape_cast %20 : vector<256xf32> to vector<256x1xf32>
    %cst_10 = arith.constant 1.280000e+02 : f32
    %22 = vector.broadcast %cst_10 : f32 to vector<256x1xf32>
    %23 = arith.divf %21, %22 : vector<256x1xf32>
    %24 = vector.broadcast %23 : vector<256x1xf32> to vector<256x128xf32>
    %25 = arith.subf %19, %24 : vector<256x128xf32>
    %26 = arith.mulf %25, %25 : vector<256x128xf32>
    %cst_11 = arith.constant dense<0.000000e+00> : vector<256xf32>
    %27 = vector.multi_reduction <add>, %26, %cst_11 [1] : vector<256x128xf32> to vector<256xf32>
    %28 = vector.shape_cast %27 : vector<256xf32> to vector<256x1xf32>
    %cst_12 = arith.constant 1.280000e+02 : f32
    %29 = vector.broadcast %cst_12 : f32 to vector<256x1xf32>
    %30 = arith.divf %28, %29 : vector<256x1xf32>
    %31 = vector.broadcast %23 : vector<256x1xf32> to vector<256x128xf32>
    %32 = arith.subf %19, %31 : vector<256x128xf32>
    %cst_13 = arith.constant 9.99999974E-6 : f32
    %33 = vector.broadcast %cst_13 : f32 to vector<256x1xf32>
    %34 = arith.addf %30, %33 : vector<256x1xf32>
    %35 = math.rsqrt %34 : vector<256x1xf32>
    %36 = vector.broadcast %35 : vector<256x1xf32> to vector<256x128xf32>
    %37 = arith.mulf %32, %36 : vector<256x128xf32>
    %38 = arith.truncf %37 : vector<256x128xf32> to vector<256x128xbf16>
    %c0_14 = arith.constant 0 : index
    %c0_15 = arith.constant 0 : index
    %39 = vector.load %arg3[%c0_14, %c0_15] : memref<128x128xbf16, #tpu.memory_space<vmem>>, vector<128x128xbf16>
    %cst_16 = arith.constant dense<0.000000e+00> : vector<256x128xf32>
    %40 = tpu.matmul %38, %39, %cst_16 {dimension_numbers = #tpu.dot_dimension_numbers<[1], [0], [0], [1], [0, 0, 1, 1], [], []>} : vector<256x128xbf16>, vector<128x128xbf16>, vector<256x128xf32> -> vector<256x128xf32>
    %c1 = arith.constant 1 : index
    %c0_17 = arith.constant 0 : index
    %41 = vector.load %arg4[%c1, %c0_17] : memref<2x128xf32, #tpu.memory_space<vmem>>, vector<1x128xf32>
    %42 = vector.broadcast %41 : vector<1x128xf32> to vector<256x128xf32>
    %43 = arith.addf %40, %42 : vector<256x128xf32>
    %c0_18 = arith.constant 0 : index
    %c0_19 = arith.constant 0 : index
    %44 = vector.load %arg5[%c0_18, %c0_19] : memref<256x128xf32, #tpu.memory_space<vmem>>, vector<256x128xf32>
    tpu.vector_store %arg5[%c0_18, %c0_19], %43 {strides = array<i32>} : memref<256x128xf32, #tpu.memory_space<vmem>>, vector<256x128xf32>,
    return
  }
  func.func @transform_0(%arg0: i32) -> (i32, i32) {
    %c0_i32 = arith.constant 0 : i32
    %c0_i32_0 = arith.constant 0 : i32
    return %arg0, %c0_i32 : i32, i32
  }
  func.func @transform_1(%arg0: i32) -> (i32, i32) {
    %c0_i32 = arith.constant 0 : i32
    %c0_i32_0 = arith.constant 0 : i32
    %c0_i32_1 = arith.constant 0 : i32
    return %c0_i32, %c0_i32_0 : i32, i32
  }
  func.func @transform_2(%arg0: i32) -> (i32, i32) {
    %c0_i32 = arith.constant 0 : i32
    %c0_i32_0 = arith.constant 0 : i32
    %c0_i32_1 = arith.constant 0 : i32
    return %c0_i32, %c0_i32_0 : i32, i32
  }
  func.func @transform_3(%arg0: i32) -> (i32, i32) {
    %c0_i32 = arith.constant 0 : i32
    %c0_i32_0 = arith.constant 0 : i32
    %c0_i32_1 = arith.constant 0 : i32
    return %c0_i32, %c0_i32_0 : i32, i32
  }
  func.func @transform_4(%arg0: i32) -> (i32, i32) {
    %c0_i32 = arith.constant 0 : i32
    %c0_i32_0 = arith.constant 0 : i32
    return %arg0, %c0_i32 : i32, i32
  }
}

</mosaic_0001>

<bundles_post_ra>
// kernel: tpu_custom_call.1
= control target key start
LH: loop header
LB: loop body
LE: loop exit
PB: predicated region body
PF: predicated region fallthrough
CT: control target
= control target key end

     0   :  { %9 = vsyncpa [#allocation3], 0  ;;  %s3034_s0 = inlined_call_operand.hbm [shape: f32[1024,128], index: 0, kind: input, shape index: {}]   ;;  %s3035_s1 = inlined_call_operand.hbm [shape: bf16[128,128], index: 1, kind: input, shape index: {}]   ;;  %s3036_s2 = inlined_call_operand.hbm [shape: bf16[128,128], index: 2, kind: input, shape index: {}]   ;;  %s3037_s3 = inlined_call_operand.vmem [shape: f32[2,128], index: 3, kind: input, shape index: {}]   ;;  %s3038_s4 = inlined_call_operand.hbm [shape: f32[1024,128], index: 4, kind: output, shape index: {}]  }
   0x1   :  { %11 = vsyncpa [#allocation3 + $0x1], 0 }
   0x2   :  { %12 = vsyncpa [#allocation6], 0 }
   0x3   :  { %13 = vsyncpa [#allocation4], 0 }
   0x4   :  { %15 = vsyncpa [#allocation4 + $0x1], 0  ;;  %s2143_s15 = smov 0   ;;  %s2145_s16 = smov 0  }
   0x5   :  { %s2147_s17 = smov 0   ;;  %s2149_s18 = smov 0  }
   0x6 LB: > { %s2164_s19 = sadd.s32 4294967295, %s2106_s18   ;;  %s1551_s20 = sadd.s32 4294967294, %s2106_s18   ;;  %s2106_s18 = sphi %s2149_s18, %s3057_s18   ;;  %s2102_s17 = sphi %s2147_s17, %s3056_s17   ;;  %s2098_s16 = sphi %s2145_s16, %s3055_s16   ;;  %s2094_s15 = sphi %s2143_s15, %s3054_s15  }
   0x7   : > { %p41_p0 = scmp.ne.s32.totalorder %s2098_s16, %s2094_s15  ;;  %p3039_p1 = scmp.eq.s32.totalorder %s2164_s19, 0 }
   0x8   : > { %p134_p3 = scmp.eq.s32.totalorder %s1551_s20, 3  ;;  %p1552_p5 = scmp.ge.s32.totalorder %s2106_s18, 1 }
   0x9   : > { %p2173_p4 = por %p3039_p1, %p41_p0  ;;  %p141_p7 = scmp.lt.s32.totalorder %s2106_s18, 5 }
   0xa   : > { %p2178_p6 = por %p134_p3, %p41_p0  ;;  %s2108_s24 = smov [#allocation5]  }
   0xb   : > { %s3042_s21 = scalar_select %p2173_p4, 1, 0 }
   0xc   : > { %s3043_s22 = scalar_select %p2178_p6, 1, 0 }
   0xd   : > { %p2183_p8 = pnand %p1552_p5, %p141_p7  ;;  %s153_s25 = sshll.u32 %s2108_s24, 4  ;;  %s154_s25 = int_to_ptr.vmem [resolvable:$true] %s153_s25 }
   0xe   : > { %s2109_s27 = smov [#allocation7]   ;;  %s1950_s5 = scalar_lea.hbm %s3035_s1, 1024 }
   0xf   : > { %s3044_s23 = scalar_select %p2183_p8, 1, 0 }
  0x10   : > { %p1745_p9 = pneg %p2183_p8  ;;  %s166_s28 = sshll.u32 %s2109_s27, 4  ;;  %s2195_s28 = int_to_ptr.vmem [resolvable:$true] %s166_s28 }
  0x11   : > { %p1951_p11 = scmp.ne.s32.totalorder %s3035_s1, %s1950_s5  ;;  %p1957_p3 = scmp.lt.u32.totalorder %s1950_s5, %s3035_s1 }
  0x12   : > { %p2191_p10 = pnand %p1745_p9, %p3039_p1 }
  0x14   : > { %p1952_p12 = pneg %p2191_p10 }
  0x16   : > { %p1953_p13 = pnand %p1952_p12, %p1951_p11 }
  0x18   : > { %p1954_p0 = pneg %p1953_p13 }
  0x1a   : > { %p1959_p5 = pnand %p1957_p3, %p1954_p0 }
  0x1c   : > { %1962 = shalt.err (!%p1959_p5)
}
  0x1d   : > { %s1963_s10 = scalar_lea.vmem %s154_s25, 1024  ;;  %p1971_p2 = scmp.lt.s32.totalorder %s154_s25, %s154_s25 }
  0x1e   : > { %p1964_p7 = scmp.ne.s32.totalorder %s154_s25, %s1963_s10  ;;  %p1972_p6 = scmp.lt.s32.totalorder %s1963_s10, %s1963_s10 }
  0x20   : > { %p1966_p9 = pnand %p1964_p7, %p1952_p12  ;;  %p1973_p4 = por %p1972_p6, %p1971_p2 }
  0x22   : > { %p1967_p1 = pneg %p1966_p9 }
  0x24   : > { %p1974_p8 = pnand %p1973_p4, %p1967_p1 }
  0x26   : > { %1977 = shalt.err (!%p1974_p8)
}
  0x27   : > { %s2110_s11 = smov 64   ;;  %s2111_s12 = smov 4  }
  0x28   : > { %1748 = dma.hbm_to_vmem [thread:$0]  (!%p2191_p10), %s3035_s1, 1024, %s154_s25, [#allocation6], %s2110_s11, %s2110_s11, %s2111_s12  }
  0x29   : > { %s1978_s27 = scalar_lea.hbm %s3036_s2, 1024 }
  0x2a   : > { %p1979_p11 = scmp.ne.s32.totalorder %s3036_s2, %s1978_s27  ;;  %p1985_p4 = scmp.lt.u32.totalorder %s1978_s27, %s3036_s2 }
  0x2c   : > { %p1981_p1 = pnand %p1979_p11, %p1952_p12 }
  0x2e   : > { %p1982_p2 = pneg %p1981_p1 }
  0x30   : > { %p1987_p6 = pnand %p1985_p4, %p1982_p2 }
  0x32   : > { %1990 = shalt.err (!%p1987_p6)
}
  0x33   : > { %s1991_s25 = scalar_lea.vmem %s2195_s28, 1024  ;;  %p1999_p3 = scmp.lt.s32.totalorder %s2195_s28, %s2195_s28 }
  0x34   : > { %p1992_p8 = scmp.ne.s32.totalorder %s2195_s28, %s1991_s25  ;;  %p2000_p5 = scmp.lt.s32.totalorder %s1991_s25, %s1991_s25 }
  0x36   : > { %p1994_p13 = pnand %p1992_p8, %p1952_p12  ;;  %p2001_p7 = por %p2000_p5, %p1999_p3 }
  0x38   : > { %p1995_p0 = pneg %p1994_p13 }
  0x3a   : > { %p2002_p9 = pnand %p2001_p7, %p1995_p0 }
  0x3c   : > { %2005 = shalt.err (!%p2002_p9)
}
  0x3d   : > { %1751 = dma.hbm_to_vmem [thread:$0]  (!%p2191_p10), %s3036_s2, 1024, %s2195_s28, [#allocation6], %s2110_s11, %s2110_s11, %s2111_s12  }
  0x3e   : > { %s2245_s9 = sadd.s32 1, %s2106_s18   ;;  %s28_s26 = sadd.s32 1, %s2102_s17 }
  0x3f   : > { %s25_s10 = ssub.s32 %s2106_s18, %s2245_s9  ;;  %p35_p12 = scmp.ne.s32.totalorder %s2102_s17, %s2098_s16 }
  0x40   : > { %p26_p11 = scmp.eq.s32.totalorder %s25_s10, 0  ;;  %p36_p1 = scmp.eq.s32.totalorder %s2106_s18, 0 }
  0x41   : > { %p3046_p2 = scmp.eq.s32.totalorder %s2164_s19, 3  ;;  %p1762_p6 = scmp.lt.s32.totalorder %s2106_s18, 4 }
  0x42   : > { %s2261_s14 = scalar_select %p26_p11, %s2102_s17, %s28_s26  }
  0x43   : > { %p2255_p4 = por %p3046_p2, %p35_p12  ;;  %p37_p8 = por %p36_p1, %p35_p12 }
  0x44   : > { %s183_s20 = sand.u32 1, %s2102_s17   ;;  %s1587_s28 = sshll.u32 %s2106_s18, 12 }
  0x45   : > { %s1556_s24 = sshll.u32 %s183_s20, 8  ;;  %s2268_s27 = scalar_lea.hbm %s3034_s0, %s1587_s28 }
  0x46   : > { %s187_s29 = scalar_lea.vmem [#allocation2], %s1556_s24  ;;  %p2272_p10 = pnand %p1762_p6, %p37_p8 }
  0x47   : > { %s194_s30 = sshll.u32 %s187_s29, 4  ;;  %s2276_s6 = scalar_lea.sflag [#allocation3], %s183_s20  ;;  %s2270_s30 = int_to_ptr.vmem [resolvable:$true] %s194_s30 }
  0x48   : > { %s2006_s25 = scalar_lea.hbm %s2268_s27, 4096  ;;  %p2008_p0 = pneg %p2272_p10 }
  0x49   : > { %p2007_p13 = scmp.ne.s32.totalorder %s2268_s27, %s2006_s25  ;;  %s2011_s26 = scalar_lea.hbm %s3034_s0, 16384 }
  0x4a   : > { %p2012_p7 = scmp.lt.u32.totalorder %s2268_s27, %s3034_s0  ;;  %p2013_p9 = scmp.lt.u32.totalorder %s2011_s26, %s2006_s25 }
  0x4b   : > { %p2009_p3 = pnand %p2008_p0, %p2007_p13  ;;  %p2015_p11 = scmp.lt.u32.totalorder %s2006_s25, %s2268_s27 }
  0x4c   : > { %p2014_p12 = por %p2013_p9, %p2012_p7 }
  0x4d   : > { %p2010_p5 = pneg %p2009_p3 }
  0x4e   : > { %p2016_p1 = por %p2015_p11, %p2014_p12 }
  0x50   : > { %p2017_p2 = pnand %p2016_p1, %p2010_p5 }
  0x52   : > { %2020 = shalt.err (!%p2017_p2)
}
  0x53   : > { %s2021_s20 = scalar_lea.vmem %s2270_s30, 4096  ;;  %s2112_s28 = smov [#allocation2]  }
  0x54   : > { %p2022_p6 = scmp.ne.s32.totalorder %s2270_s30, %s2021_s20  ;;  %s2026_s11 = sshll.u32 %s2112_s28, 4  ;;  %s2027_s11 = int_to_ptr.vmem [resolvable:$false] %s2026_s11 }
  0x55   : > { %s2028_s12 = scalar_lea.vmem %s2027_s11, 8192  ;;  %p2029_p3 = scmp.lt.s32.totalorder %s2270_s30, %s2027_s11 }
  0x56   : > { %p2024_p8 = pnand %p2022_p6, %p2008_p0  ;;  %p2030_p7 = scmp.lt.s32.totalorder %s2028_s12, %s2021_s20 }
  0x58   : > { %p2025_p13 = pneg %p2024_p8  ;;  %p2031_p9 = por %p2030_p7, %p2029_p3 }
  0x5a   : > { %p2032_p12 = pnand %p2031_p9, %p2025_p13 }
  0x5c   : > { %2035 = shalt.err (!%p2032_p12)
}
  0x5d   : > { %s2113_s29 = smov 128   ;;  %s2114_s25 = smov 8  }
  0x5e   : > { %1755 = dma.hbm_to_vmem [thread:$0]  (!%p2272_p10), %s2268_s27, 4096, %s2270_s30, %s2276_s6, %s2113_s29, %s2113_s29, %s2114_s25  }
  0x5f   : > { %p3049_p0 = scmp.ne.s32.totalorder %s3044_s23, 0 }
  0x60   : > { %s2307_s7 = sand.u32 (!%p3049_p0), 1, %s2098_s16   ;;  %p3050_p5 = scmp.ne.s32.totalorder (!%p3049_p0), %s3042_s21, 0 }
  0x61   : > { %206 = sbr.rel (%p3049_p0) target bundleno = 992 (0x3e0), region = 36  ;;  %s1560_s8 = sshll.u32 (!%p3049_p0), %s2307_s7, 8 }
  0x62   : > { %s209_s26 = scalar_lea.sflag (!%p3049_p0), [#allocation3], %s2307_s7  ;;  %s2313_s10 = scalar_lea.vmem (!%p3049_p0), [#allocation2], %s1560_s8 }
  0x68   : > { %2081 = dma.done.wait (%p3050_p5), %s209_s26, 4096  }
  0x69   : > { %2083 = vsyncadd (%p3050_p5), %s209_s26, 4294963200  ;;  %p3051_p10 = scmp.eq.s32.totalorder %s2164_s19, 0 }
  0x6b   : > { %2085 = dma.done.wait (%p3051_p10), [#allocation6], 2048   ;;  %p3052_p11 = pmov %p3051_p10 }
  0x6c   : > { %v1806_v0 = vld [vmem:[#allocation5] sm:$0xff]   ;;  %v1807_v1 = vld [vmem:[#allocation5 + $0x8] sm:$0xff]   ;;  %v1808_v2 = vld [vmem:[#allocation5 + $0x10] sm:$0xff]   ;;  %s2920_s5 = scalar_lea.vmem [#allocation8], %s1560_s8  ;;  %s1588_s6 = sshll.u32 %s2164_s19, 12 }
  0x6d   : > { %2087 = vsyncadd (%p3052_p11), [#allocation6], 4294965248  ;;  %1637 = vmatprep.subr.bf16.mxu0 %v1806_v0  ;;  %v1809_v3 = vld [vmem:[#allocation5 + $0x18] sm:$0xff]   ;;  %v248_v4 = vld [vmem:[%s2313_s10] sm:$0xff]  ;;  %s1459_s24 = sshll.u32 %s2920_s5, 4  ;;  %s2985_s11 = scalar_lea.hbm %s3038_s4, %s1588_s6  ;;  %s2987_s24 = int_to_ptr.vmem [resolvable:$true] %s1459_s24 }
  0x6e   : > { %1638 = vmatpush3.bf16.msra.mxu0 %v1806_v0  ;;  %v249_v5 = vld [vmem:[%s2313_s10 + $0x8] sm:$0xff]  ;;  %v1810_v7 = vld [vmem:[#allocation5 + $0x20] sm:$0xff]   ;;  %v1812_v9 = vld [vmem:[#allocation5 + $0x30] sm:$0xff]   ;;  %s1446_s19 = scalar_lea.sflag [#allocation4], %s2307_s7  ;;  %s2036_s12 = scalar_lea.vmem %s2987_s24, 4096 }
  0x6f   : > { %1639 = vmatprep.subr.bf16.mxu0 %v1807_v1  ;;  %v280_v6 = vpack.c.bf16 %v249_v5, %v248_v4  ;;  %v1811_v8 = vld [vmem:[#allocation5 + $0x28] sm:$0xff]   ;;  %v1813_v10 = vld [vmem:[#allocation5 + $0x38] sm:$0xff]   ;;  %v250_v11 = vld [vmem:[%s2313_s10 + $0x10] sm:$0xff]  ;;  %p2037_p1 = scmp.ne.s32.totalorder %s2987_s24, %s2036_s12  ;;  %s2115_s29 = smov [#allocation8]  }
  0x70   : > { %v251_v12 = vld [vmem:[%s2313_s10 + $0x18] sm:$0xff]  ;;  %v252_v13 = vld [vmem:[%s2313_s10 + $0x20] sm:$0xff]  ;;  %v253_v14 = vld [vmem:[%s2313_s10 + $0x28] sm:$0xff]  ;;  %s2040_s25 = sshll.u32 %s2115_s29, 4  ;;  %s2041_s25 = int_to_ptr.vmem [resolvable:$false] %s2040_s25 }
  0x71   : > { %1653 = vmatprep.mubr.bf16.mxu0 %v280_v6  ;;  %v281_v15 = vpack.c.bf16 %v251_v12, %v250_v11  ;;  %v282_v16 = vpack.c.bf16 %v253_v14, %v252_v13  ;;  %v254_v17 = vld [vmem:[%s2313_s10 + $0x30] sm:$0xff]  ;;  %v255_v18 = vld [vmem:[%s2313_s10 + $0x38] sm:$0xff]  ;;  %v256_v19 = vld [vmem:[%s2313_s10 + $0x40] sm:$0xff]  ;;  %p2038_p2 = pnand %p2037_p1, %p2255_p4  ;;  %s2042_s8 = scalar_lea.vmem %s2041_s25, 8192 }
  0x72   : > { %1640 = vmatpush3.bf16.msra.mxu0 %v1807_v1  ;;  %v257_v20 = vld [vmem:[%s2313_s10 + $0x48] sm:$0xff]  ;;  %v283_v21 = vpack.c.bf16 %v255_v18, %v254_v17  ;;  %v258_v23 = vld [vmem:[%s2313_s10 + $0x50] sm:$0xff]  ;;  %v259_v24 = vld [vmem:[%s2313_s10 + $0x58] sm:$0xff]  ;;  %p2043_p8 = scmp.lt.s32.totalorder %s2987_s24, %s2041_s25  ;;  %p2044_p13 = scmp.lt.s32.totalorder %s2042_s8, %s2036_s12 }
  0x73   : > { %1641 = vmatprep.subr.bf16.mxu0 %v1808_v2  ;;  %v284_v22 = vpack.c.bf16 %v257_v20, %v256_v19  ;;  %v260_v25 = vld [vmem:[%s2313_s10 + $0x60] sm:$0xff]  ;;  %v261_v26 = vld [vmem:[%s2313_s10 + $0x68] sm:$0xff]  ;;  %v285_v27 = vpack.c.bf16 %v259_v24, %v258_v23  ;;  %v262_v29 = vld [vmem:[%s2313_s10 + $0x70] sm:$0xff]  ;;  %p2039_p6 = pneg %p2038_p2 }
  0x74   : > { %v286_v28 = vpack.c.bf16 %v261_v26, %v260_v25  ;;  %v263_v30 = vld [vmem:[%s2313_s10 + $0x78] sm:$0xff]  ;;  %v264_v31 = vld [vmem:[%s2313_s10 + $0x80] sm:$0xff]  ;;  %v265_v32 = vld [vmem:[%s2313_s10 + $0x88] sm:$0xff]  ;;  %p2045_p3 = por %p2044_p13, %p2043_p8 }
  0x75   : > { %v287_v33 = vpack.c.bf16 %v263_v30, %v262_v29  ;;  %v288_v34 = vpack.c.bf16 %v265_v32, %v264_v31  ;;  %v266_v35 = vld [vmem:[%s2313_s10 + $0x90] sm:$0xff]  ;;  %v267_v36 = vld [vmem:[%s2313_s10 + $0x98] sm:$0xff]  ;;  %v268_v37 = vld [vmem:[%s2313_s10 + $0xa0] sm:$0xff] }
  0x76   : > { %1642 = vmatpush3.bf16.msra.mxu0 %v1808_v2  ;;  %v269_v38 = vld [vmem:[%s2313_s10 + $0xa8] sm:$0xff]  ;;  %v289_v39 = vpack.c.bf16 %v267_v36, %v266_v35  ;;  %v270_v41 = vld [vmem:[%s2313_s10 + $0xb0] sm:$0xff]  ;;  %v271_v42 = vld [vmem:[%s2313_s10 + $0xb8] sm:$0xff]  ;;  %p2046_p7 = pnand %p2045_p3, %p2039_p6 }
  0x77   : > { %1643 = vmatprep.subr.bf16.mxu0 %v1809_v3  ;;  %v290_v40 = vpack.c.bf16 %v269_v38, %v268_v37  ;;  %v272_v43 = vld [vmem:[%s2313_s10 + $0xc0] sm:$0xff]  ;;  %v273_v44 = vld [vmem:[%s2313_s10 + $0xc8] sm:$0xff]  ;;  %v291_v45 = vpack.c.bf16 %v271_v42, %v270_v41  ;;  %v274_v47 = vld [vmem:[%s2313_s10 + $0xd0] sm:$0xff] }
  0x78   : > { %v292_v46 = vpack.c.bf16 %v273_v44, %v272_v43  ;;  %v275_v48 = vld [vmem:[%s2313_s10 + $0xd8] sm:$0xff]  ;;  %v276_v49 = vld [vmem:[%s2313_s10 + $0xe0] sm:$0xff]  ;;  %v277_v50 = vld [vmem:[%s2313_s10 + $0xe8] sm:$0xff] }
  0x79   : > { %v293_v51 = vpack.c.bf16 %v275_v48, %v274_v47  ;;  %v294_v52 = vpack.c.bf16 %v277_v50, %v276_v49  ;;  %v278_v53 = vld [vmem:[%s2313_s10 + $0xf0] sm:$0xff]  ;;  %v279_v54 = vld [vmem:[%s2313_s10 + $0xf8] sm:$0xff]  ;;  %v2358_v56 = vld [vmem:[%s3037_s3] ss:$0 sm:$0xff] }
  0x7a   : > { %1644 = vmatpush3.bf16.msra.mxu0 %v1809_v3  ;;  %v295_v55 = vpack.c.bf16 %v279_v54, %v278_v53 }
  0x7b   : > { %1645 = vmatprep.subr.bf16.mxu0 %v1810_v7 }
  0x7e   : > { %1646 = vmatpush3.bf16.msra.mxu0 %v1810_v7 }
  0x7f   : > { %1647 = vmatprep.subr.bf16.mxu0 %v1811_v8 }
  0x82   : > { %1648 = vmatpush3.bf16.msra.mxu0 %v1811_v8 }
  0x83   : > { %1649 = vmatprep.subr.bf16.mxu0 %v1812_v9 }
  0x86   : > { %1650 = vmatpush3.bf16.msra.mxu0 %v1812_v9 }
  0x87   : > { %1651 = vmatprep.subr.bf16.mxu0 %v1813_v10 }
  0x8a   : > { %1652 = vmatpush3.bf16.msra.mxu0 %v1813_v10 }
  0x8d   : > { %1654 = vmatmul.mubr.bf16.vlgmr.msra.gmra.mrb[0].mxu0 %v281_v15 }
  0x8e   : > { %1657 = vmatprep.mubr.bf16.mxu0 %v282_v16 }
  0x95   : > { %1658 = vmatmul.mubr.bf16.gmra.mrb[4].mxu0 %v283_v21 }
  0x96   : > { %1661 = vmatprep.mubr.bf16.mxu0 %v284_v22 }
  0x9d   : > { %1662 = vmatmul.mubr.bf16.gmra.mrb[8].mxu0 %v285_v27 }
  0x9e   : > { %1665 = vmatprep.mubr.bf16.mxu0 %v286_v28 }
  0xa5   : > { %1666 = vmatmul.mubr.bf16.gmra.mrb[12].mxu0 %v287_v33 }
  0xa6   : > { %1669 = vmatprep.mubr.bf16.mxu0 %v288_v34 }
  0xad   : > { %1670 = vmatmul.mubr.bf16.gmra.mrb[16].mxu0 %v289_v39 }
  0xae   : > { %1673 = vmatprep.mubr.bf16.mxu0 %v290_v40 }
  0xb5   : > { %1674 = vmatmul.mubr.bf16.gmra.mrb[20].mxu0 %v291_v45 }
  0xb6   : > { %1677 = vmatprep.mubr.bf16.mxu0 %v292_v46 }
  0xbd   : > { %1678 = vmatmul.mubr.bf16.gmra.mrb[24].mxu0 %v293_v51 }
  0xbe   : > { %1681 = vmatprep.mubr.bf16.mxu0 %v294_v52 }
  0xc5   : > { %1682 = vmatmul.mubr.bf16.gmra.mrb[28].mxu0 %v295_v55 }
 0x160   : > { %v1655_v57 = vpop.f32.mrb[0].mxu0 }
 0x161   : > { %v408_v58 = vadd.f32 %v1655_v57, %v2358_v56  ;;  %v399_v59 = vpop.f32.mrb[1].mxu0 }
 0x162   : > { %v2362_v60 = vadd.f32 %v2358_v56, %v399_v59  ;;  %v1656_v61 = vpop.f32.mrb[2].mxu0 }
 0x163   : > { %v560_v62 = vmul.f32 0.044715, %v408_v58  ;;  %v2365_v63 = vadd.f32 %v1656_v61, %v2358_v56  ;;  %v402_v0 = vpop.f32.mrb[3].mxu0  ;;  %v528_v48 = vmul.f32 0.5, %v408_v58 }
 0x164   : > { %v558_v1 = vmul.f32 0.044715, %v2362_v60  ;;  %v2369_v2 = vadd.f32 %v2358_v56, %v402_v0  ;;  %v526_v57 = vmul.f32 0.5, %v2362_v60 }
 0x165   : > { %v561_v3 = vmul.f32 0.044715, %v2365_v63  ;;  %v592_v4 = vmul.f32 %v560_v62, %v408_v58 }
 0x166   : > { %v559_v5 = vmul.f32 0.044715, %v2369_v2  ;;  %v590_v6 = vmul.f32 %v558_v1, %v2362_v60 }
 0x167   : > { %v624_v7 = vmul.f32 %v592_v4, %v408_v58  ;;  %v593_v8 = vmul.f32 %v561_v3, %v2365_v63  ;;  %v529_v3 = vmul.f32 0.5, %v2365_v63  ;;  %v527_v4 = vmul.f32 0.5, %v2369_v2 }
 0x168   : > { %v1659_v9 = vpop.f32.mrb[4].mxu0  ;;  %v622_v10 = vmul.f32 %v590_v6, %v2362_v60  ;;  %v591_v11 = vmul.f32 %v559_v5, %v2369_v2 }
 0x169   : > { %v2378_v12 = vadd.f32 %v1659_v9, %v2358_v56  ;;  %v415_v13 = vpop.f32.mrb[5].mxu0  ;;  %v656_v14 = vadd.f32 %v624_v7, %v408_v58  ;;  %v625_v15 = vmul.f32 %v593_v8, %v2365_v63 }
 0x16a   : > { %v2382_v16 = vadd.f32 %v2358_v56, %v415_v13  ;;  %v1660_v17 = vpop.f32.mrb[6].mxu0  ;;  %v654_v18 = vadd.f32 %v622_v10, %v2362_v60  ;;  %v623_v19 = vmul.f32 %v591_v11, %v2369_v2 }
 0x16b   : > { %v564_v20 = vmul.f32 0.044715, %v2378_v12  ;;  %v2388_v21 = vadd.f32 %v1660_v17, %v2358_v56  ;;  %v418_v22 = vpop.f32.mrb[7].mxu0  ;;  %v688_v23 = vmul.f32 0.7978846, %v656_v14  ;;  %v657_v24 = vadd.f32 %v625_v15, %v2365_v63 }
 0x16c   : > { %v562_v25 = vmul.f32 0.044715, %v2382_v16  ;;  %v2393_v26 = vadd.f32 %v2358_v56, %v418_v22  ;;  %v686_v27 = vmul.f32 0.7978846, %v654_v18  ;;  %v655_v28 = vadd.f32 %v623_v19, %v2369_v2 }
 0x16d   : > { %v565_v29 = vmul.f32 0.044715, %v2388_v21  ;;  %1822 = vtanh.f32 %v688_v23  ;;  %v689_v30 = vmul.f32 0.7978846, %v657_v24  ;;  %v596_v34 = vmul.f32 %v564_v20, %v2378_v12 }
 0x16e   : > { %v563_v31 = vmul.f32 0.044715, %v2393_v26  ;;  %1824 = vtanh.f32 %v686_v27  ;;  %v687_v32 = vmul.f32 0.7978846, %v655_v28  ;;  %v594_v33 = vmul.f32 %v562_v25, %v2382_v16 }
 0x16f   : > { %1826 = vtanh.f32 %v689_v30  ;;  %v628_v40 = vmul.f32 %v596_v34, %v2378_v12  ;;  %v597_v41 = vmul.f32 %v565_v29, %v2388_v21  ;;  %v530_v25 = vmul.f32 0.5, %v2382_v16 }
 0x170   : > { %v1663_v35 = vpop.f32.mrb[8].mxu0  ;;  %1828 = vtanh.f32 %v687_v32  ;;  %v626_v36 = vmul.f32 %v594_v33, %v2382_v16  ;;  %v595_v37 = vmul.f32 %v563_v31, %v2393_v26  ;;  %v531_v27 = vmul.f32 0.5, %v2393_v26 }
 0x171   : > { %v2403_v38 = vadd.f32 %v1663_v35, %v2358_v56  ;;  %v431_v39 = vpop.f32.mrb[9].mxu0  ;;  %v660_v49 = vadd.f32 %v628_v40, %v2378_v12  ;;  %v629_v50 = vmul.f32 %v597_v41, %v2388_v21  ;;  %v532_v30 = vmul.f32 0.5, %v2378_v12 }
 0x172   : > { %v2408_v42 = vadd.f32 %v2358_v56, %v431_v39  ;;  %v1664_v43 = vpop.f32.mrb[10].mxu0  ;;  %v658_v44 = vadd.f32 %v626_v36, %v2382_v16  ;;  %v627_v45 = vmul.f32 %v595_v37, %v2393_v26  ;;  %v533_v33 = vmul.f32 0.5, %v2388_v21 }
 0x173   : > { %v2413_v46 = vadd.f32 %v1664_v43, %v2358_v56  ;;  %v434_v47 = vpop.f32.mrb[11].mxu0  ;;  %v568_v55 = vmul.f32 0.044715, %v2403_v38  ;;  %v692_v59 = vmul.f32 0.7978846, %v660_v49  ;;  %v661_v61 = vadd.f32 %v629_v50, %v2388_v21 }
 0x174   : > { %v566_v51 = vmul.f32 0.044715, %v2408_v42  ;;  %v435_v52 = vadd.f32 %v2358_v56, %v434_v47  ;;  %v690_v53 = vmul.f32 0.7978846, %v658_v44  ;;  %v659_v54 = vadd.f32 %v627_v45, %v2393_v26 }
 0x175   : > { %v693_v5 = vmul.f32 0.7978846, %v661_v61  ;;  %v569_v7 = vmul.f32 0.044715, %v2413_v46  ;;  %v600_v15 = vmul.f32 %v568_v55, %v2403_v38  ;;  %v534_v44 = vmul.f32 0.5, %v2408_v42 }
 0x176   : > { %v567_v62 = vmul.f32 0.044715, %v435_v52  ;;  %1830 = vtanh.f32 %v690_v53  ;;  %v691_v58 = vmul.f32 0.7978846, %v659_v54  ;;  %v598_v0 = vmul.f32 %v566_v51, %v2408_v42 }
 0x177   : > { %v1823_v1 = vpop.eup %1822  ;;  %1832 = vtanh.f32 %v692_v59  ;;  %v632_v26 = vmul.f32 %v600_v15, %v2403_v38  ;;  %v601_v36 = vmul.f32 %v569_v7, %v2413_v46  ;;  %v2464_v45 = vmul.f32 0.5, %v435_v52 }
 0x178   : > { %v1825_v6 = vpop.eup %1824  ;;  %v1667_v8 = vpop.f32.mrb[12].mxu0  ;;  %v752_v60 = vadd.f32 1.0, %v1823_v1  ;;  %1834 = vtanh.f32 %v691_v58  ;;  %v630_v9 = vmul.f32 %v598_v0, %v2408_v42  ;;  %v599_v14 = vmul.f32 %v567_v62, %v435_v52 }
 0x179   : > { %v1827_v10 = vpop.eup %1826  ;;  %v447_v11 = vpop.f32.mrb[13].mxu0  ;;  %v750_v13 = vadd.f32 1.0, %v1825_v6  ;;  %1836 = vtanh.f32 %v693_v5  ;;  %v2446_v32 = vadd.f32 %v1667_v8, %v2358_v56  ;;  %v664_v39 = vadd.f32 %v632_v26, %v2403_v38 }
 0x17a   : > { %v1829_v63 = vpop.eup %1828  ;;  %v2430_v2 = vadd.f32 %v2358_v56, %v447_v11  ;;  %v1668_v17 = vpop.f32.mrb[14].mxu0  ;;  %v2432_v18 = vmul.f32 %v752_v60, %v528_v48  ;;  %v753_v19 = vadd.f32 1.0, %v1827_v10  ;;  %v662_v20 = vadd.f32 %v630_v9, %v2408_v42 }
 0x17b   : > { %v450_v22 = vpop.f32.mrb[15].mxu0  ;;  %v2435_v23 = vmul.f32 %v750_v13, %v526_v57  ;;  %v751_v24 = vadd.f32 1.0, %v1829_v63  ;;  %v631_v16 = vmul.f32 %v599_v14, %v435_v52  ;;  %v2460_v21 = vadd.f32 %v1668_v17, %v2358_v56 }
 0x17c   : > { %v570_v28 = vmul.f32 0.044715, %v2430_v2  ;;  %v2441_v29 = vadd.f32 %v2358_v56, %v450_v22  ;;  %818 = vadd.xlane.f32.xlu1 %v2432_v18  ;;  %v694_v31 = vmul.f32 0.7978846, %v662_v20  ;;  %v2451_v34 = vmul.f32 %v753_v19, %v529_v3 }
 0x17d   : > { %814 = vadd.xlane.f32.xlu0 %v2435_v23  ;;  %v2453_v35 = vmul.f32 %v751_v24, %v527_v4  ;;  %v663_v37 = vadd.f32 %v631_v16, %v435_v52  ;;  %v633_v47 = vmul.f32 %v601_v36, %v2413_v46  ;;  %v572_v49 = vmul.f32 0.044715, %v2446_v32 }
 0x17e   : > { %1838 = vtanh.f32 %v694_v31  ;;  %v571_v12 = vmul.f32 0.044715, %v2441_v29  ;;  %v602_v40 = vmul.f32 %v570_v28, %v2430_v2  ;;  %v696_v59 = vmul.f32 0.7978846, %v664_v39 }
 0x17f   : > { %v695_v53 = vmul.f32 0.7978846, %v663_v37  ;;  %v665_v42 = vadd.f32 %v633_v47, %v2413_v46  ;;  %v573_v4 = vmul.f32 0.044715, %v2460_v21  ;;  %v2480_v6 = vmul.f32 0.5, %v2403_v38 }
 0x180   : > { %v1831_v41 = vpop.eup %1830  ;;  %820 = vadd.xlane.f32.xlu1 %v2451_v34  ;;  %v1671_v43 = vpop.f32.mrb[16].mxu0  ;;  %v634_v52 = vmul.f32 %v602_v40, %v2430_v2  ;;  %v603_v3 = vmul.f32 %v571_v12, %v2441_v29  ;;  %v2483_v7 = vmul.f32 0.5, %v2413_v46  ;;  %v604_v14 = vmul.f32 %v572_v49, %v2446_v32 }
 0x181   : > { %v1833_v48 = vpop.eup %1832  ;;  %v463_v50 = vpop.f32.mrb[17].mxu0  ;;  %816 = vadd.xlane.f32.xlu0 %v2453_v35  ;;  %v754_v51 = vadd.f32 1.0, %v1831_v41  ;;  %1840 = vtanh.f32 %v695_v53  ;;  %v697_v9 = vmul.f32 0.7978846, %v665_v42  ;;  %v2489_v10 = vadd.f32 %v1671_v43, %v2358_v56 }
 0x182   : > { %v1835_v54 = vpop.eup %1834  ;;  %v2470_v55 = vadd.f32 %v2358_v56, %v463_v50  ;;  %v1672_v57 = vpop.f32.mrb[18].mxu0  ;;  %v756_v1 = vadd.f32 1.0, %v1833_v48  ;;  %1842 = vtanh.f32 %v696_v59  ;;  %v666_v38 = vadd.f32 %v634_v52, %v2430_v2 }
 0x183   : > { %v1837_v61 = vpop.eup %1836  ;;  %v466_v62 = vpop.f32.mrb[19].mxu0  ;;  %v2474_v58 = vmul.f32 %v754_v51, %v530_v25  ;;  %v755_v0 = vadd.f32 1.0, %v1835_v54  ;;  %1844 = vtanh.f32 %v697_v9  ;;  %v635_v13 = vmul.f32 %v603_v3, %v2441_v29 }
 0x184   : > { %v574_v5 = vmul.f32 0.044715, %v2470_v55  ;;  %v757_v60 = vadd.f32 1.0, %v1837_v61  ;;  %v2492_v11 = vadd.f32 %v2358_v56, %v466_v62  ;;  %v2496_v46 = vmul.f32 %v756_v1, %v532_v30 }
 0x185   : > { %822 = vadd.xlane.f32.xlu0 %v2474_v58  ;;  %v2486_v8 = vmul.f32 %v755_v0, %v531_v27  ;;  %v2501_v63 = vadd.f32 %v1672_v57, %v2358_v56  ;;  %v698_v19 = vmul.f32 0.7978846, %v666_v38  ;;  %v605_v20 = vmul.f32 %v573_v4, %v2460_v21 }
 0x186   : > { %v606_v22 = vmul.f32 %v574_v5, %v2470_v55  ;;  %v2506_v25 = vmul.f32 %v757_v60, %v533_v33  ;;  %v667_v28 = vadd.f32 %v635_v13, %v2441_v29  ;;  %v636_v30 = vmul.f32 %v604_v14, %v2446_v32 }
 0x187   : > { %824 = vadd.xlane.f32.xlu1 %v2486_v8  ;;  %v575_v31 = vmul.f32 0.044715, %v2492_v11  ;;  %1846 = vtanh.f32 %v698_v19  ;;  %v637_v26 = vmul.f32 %v605_v20, %v2460_v21  ;;  %v576_v12 = vmul.f32 0.044715, %v2489_v10 }
 0x188   : > { %v1839_v15 = vpop.eup %1838  ;;  %v1675_v17 = vpop.f32.mrb[20].mxu0  ;;  %v638_v36 = vmul.f32 %v606_v22, %v2470_v55  ;;  %v538_v39 = vmul.f32 0.5, %v2430_v2  ;;  %v699_v40 = vmul.f32 0.7978846, %v667_v28  ;;  %v2519_v41 = vmul.f32 0.5, %v2441_v29 }
 0x189   : > { %v479_v24 = vpop.f32.mrb[21].mxu0  ;;  %826 = vadd.xlane.f32.xlu0 %v2496_v46  ;;  %v758_v27 = vadd.f32 1.0, %v1839_v15  ;;  %v2522_v43 = vmul.f32 0.5, %v2446_v32  ;;  %v668_v47 = vadd.f32 %v636_v30, %v2446_v32  ;;  %v669_v48 = vadd.f32 %v637_v26, %v2460_v21 }
 0x18a   : > { %v1676_v16 = vpop.f32.mrb[22].mxu0  ;;  %v577_v49 = vmul.f32 0.044715, %v2501_v63  ;;  %1848 = vtanh.f32 %v699_v40  ;;  %v670_v2 = vadd.f32 %v638_v36, %v2470_v55  ;;  %v2533_v29 = vadd.f32 %v2358_v56, %v479_v24 }
 0x18b   : > { %v482_v37 = vpop.f32.mrb[23].mxu0  ;;  %828 = vadd.xlane.f32.xlu1 %v2506_v25  ;;  %v2515_v33 = vmul.f32 %v758_v27, %v534_v44  ;;  %v2529_v44 = vmul.f32 0.5, %v2460_v21  ;;  %v700_v50 = vmul.f32 0.7978846, %v668_v47  ;;  %v701_v51 = vmul.f32 0.7978846, %v669_v48  ;;  %v1841_v32 = vpop.eup %1840 }
 0x18c   : > { %v607_v53 = vmul.f32 %v575_v31, %v2492_v11  ;;  %v2537_v54 = vadd.f32 %v1675_v17, %v2358_v56  ;;  %v2540_v57 = vadd.f32 %v1676_v16, %v2358_v56  ;;  %v702_v59 = vmul.f32 0.7978846, %v670_v2  ;;  %v1843_v42 = vpop.eup %1842 }
 0x18d   : > { %830 = vadd.xlane.f32.xlu0 %v2515_v33  ;;  %v608_v21 = vmul.f32 %v576_v12, %v2489_v10  ;;  %v2544_v52 = vadd.f32 %v2358_v56, %v482_v37  ;;  %v759_v61 = vadd.f32 1.0, %v1841_v32  ;;  %1850 = vtanh.f32 %v700_v50  ;;  %v1845_v1 = vpop.eup %1844 }
 0x18e   : > { %v639_v0 = vmul.f32 %v607_v53, %v2492_v11  ;;  %v760_v4 = vadd.f32 1.0, %v1843_v42  ;;  %1852 = vtanh.f32 %v701_v51  ;;  %v609_v60 = vmul.f32 %v577_v49, %v2501_v63 }
 0x18f   : > { %v640_v5 = vmul.f32 %v608_v21, %v2489_v10  ;;  %v578_v9 = vmul.f32 0.044715, %v2533_v29  ;;  %v2551_v38 = vmul.f32 %v759_v61, %v2464_v45  ;;  %v761_v14 = vadd.f32 1.0, %v1845_v1 }
 0x190   : > { %v1679_v62 = vpop.f32.mrb[24].mxu0  ;;  %1854 = vtanh.f32 %v702_v59  ;;  %v2554_v15 = vmul.f32 %v760_v4, %v2480_v6  ;;  %v542_v20 = vmul.f32 0.5, %v2470_v55  ;;  %v671_v22 = vadd.f32 %v639_v0, %v2492_v11 }
 0x191   : > { %v495_v3 = vpop.f32.mrb[25].mxu0  ;;  %v1847_v24 = vpop.eup %1846  ;;  %v580_v27 = vmul.f32 0.044715, %v2537_v54  ;;  %v581_v45 = vmul.f32 0.044715, %v2540_v57  ;;  %832 = vadd.xlane.f32.xlu1 %v2551_v38  ;;  %v672_v6 = vadd.f32 %v640_v5, %v2489_v10  ;;  %v2568_v31 = vmul.f32 0.5, %v2492_v11 }
 0x192   : > { %v1680_v13 = vpop.f32.mrb[26].mxu0  ;;  %v579_v28 = vmul.f32 0.044715, %v2544_v52  ;;  %834 = vadd.xlane.f32.xlu0 %v2554_v15  ;;  %v762_v30 = vadd.f32 1.0, %v1847_v24  ;;  %v703_v55 = vmul.f32 0.7978846, %v671_v22  ;;  %v641_v16 = vmul.f32 %v609_v60, %v2501_v63 }
 0x193   : > { %v2557_v17 = vadd.f32 %v1680_v13, %v2358_v56  ;;  %v498_v19 = vpop.f32.mrb[27].mxu0  ;;  %v2572_v26 = vadd.f32 %v1679_v62, %v2358_v56  ;;  %v2575_v36 = vmul.f32 %v761_v14, %v2483_v7  ;;  %v704_v12 = vmul.f32 0.7978846, %v672_v6 }
 0x194   : > { %v610_v37 = vmul.f32 %v578_v9, %v2533_v29  ;;  %v1849_v40 = vpop.eup %1848  ;;  %v2579_v47 = vadd.f32 %v2358_v56, %v495_v3  ;;  %v2581_v48 = vmul.f32 %v762_v30, %v538_v39  ;;  %1856 = vtanh.f32 %v703_v55 }
 0x195   : > { %v673_v11 = vadd.f32 %v641_v16, %v2501_v63  ;;  %836 = vadd.xlane.f32.xlu1 %v2575_v36  ;;  %v763_v49 = vadd.f32 1.0, %v1849_v40  ;;  %1858 = vtanh.f32 %v704_v12  ;;  %v611_v50 = vmul.f32 %v579_v28, %v2544_v52 }
 0x196   : > { %v642_v7 = vmul.f32 %v610_v37, %v2533_v29  ;;  %v2588_v51 = vadd.f32 %v2358_v56, %v498_v19  ;;  %838 = vadd.xlane.f32.xlu0 %v2581_v48  ;;  %v612_v59 = vmul.f32 %v580_v27, %v2537_v54  ;;  %v544_v9 = vmul.f32 0.5, %v2489_v10 }
 0x197   : > { %v705_v32 = vmul.f32 0.7978846, %v673_v11  ;;  %v1851_v21 = vpop.eup %1850  ;;  %v2596_v42 = vmul.f32 %v763_v49, %v2519_v41  ;;  %v643_v1 = vmul.f32 %v611_v50, %v2544_v52  ;;  %v582_v41 = vmul.f32 0.044715, %v2579_v47 }
 0x198   : > { %v1683_v2 = vpop.f32.mrb[28].mxu0  ;;  %v674_v0 = vadd.f32 %v642_v7, %v2533_v29  ;;  %v1853_v3 = vpop.eup %1852  ;;  %v764_v4 = vadd.f32 1.0, %v1851_v21  ;;  %v583_v24 = vmul.f32 0.044715, %v2588_v51  ;;  %v584_v10 = vmul.f32 0.044715, %v2572_v26 }
 0x199   : > { %v2592_v39 = vadd.f32 %v1683_v2, %v2358_v56  ;;  %v511_v53 = vpop.f32.mrb[29].mxu0  ;;  %1860 = vtanh.f32 %v705_v32  ;;  %840 = vadd.xlane.f32.xlu1 %v2596_v42  ;;  %v765_v19 = vadd.f32 1.0, %v1853_v3  ;;  %v675_v6 = vadd.f32 %v643_v1, %v2544_v52 }
 0x19a   : > { %v2599_v61 = vadd.f32 %v2358_v56, %v511_v53  ;;  %v1684_v62 = vpop.f32.mrb[30].mxu0  ;;  %v1855_v13 = vpop.eup %1854  ;;  %v706_v22 = vmul.f32 0.7978846, %v674_v0  ;;  %v2614_v27 = vmul.f32 %v764_v4, %v2522_v43  ;;  %v644_v55 = vmul.f32 %v612_v59, %v2537_v54 }
 0x19b   : > { %v2604_v5 = vadd.f32 %v1684_v62, %v2358_v56  ;;  %v514_v60 = vpop.f32.mrb[31].mxu0  ;;  %v766_v28 = vadd.f32 1.0, %v1855_v13  ;;  %v2619_v30 = vmul.f32 %v765_v19, %v2529_v44  ;;  %v545_v16 = vmul.f32 0.5, %v2501_v63 }
 0x19c   : > { %v2610_v14 = vadd.f32 %v2358_v56, %v514_v60  ;;  %1862 = vtanh.f32 %v706_v22  ;;  %842 = vadd.xlane.f32.xlu0 %v2614_v27  ;;  %v707_v12 = vmul.f32 0.7978846, %v675_v6  ;;  %v613_v43 = vmul.f32 %v581_v45, %v2540_v57 }
 0x19d   : > { %v2623_v56 = vmul.f32 %v766_v28, %v542_v20  ;;  %v585_v37 = vmul.f32 0.044715, %v2557_v17  ;;  %844 = vadd.xlane.f32.xlu1 %v2619_v30  ;;  %v546_v40 = vmul.f32 0.5, %v2533_v29  ;;  %v676_v44 = vadd.f32 %v644_v55, %v2537_v54 }
 0x19e   : > { %v614_v11 = vmul.f32 %v582_v41, %v2579_v47  ;;  %v1857_v49 = vpop.eup %1856  ;;  %v588_v2 = vmul.f32 0.044715, %v2592_v39  ;;  %1864 = vtanh.f32 %v707_v12  ;;  %v645_v20 = vmul.f32 %v613_v43, %v2540_v57 }
 0x19f   : > { %v615_v63 = vmul.f32 %v583_v24, %v2588_v51  ;;  %v1859_v7 = vpop.eup %1858  ;;  %v767_v45 = vadd.f32 1.0, %v1857_v49  ;;  %v708_v50 = vmul.f32 0.7978846, %v676_v44  ;;  %v616_v32 = vmul.f32 %v584_v10, %v2572_v26 }
 0x1a0   : > { %v646_v53 = vmul.f32 %v614_v11, %v2579_v47  ;;  %v586_v29 = vmul.f32 0.044715, %v2599_v61  ;;  %846 = vadd.xlane.f32.xlu0 %v2623_v56  ;;  %v768_v59 = vadd.f32 1.0, %v1859_v7  ;;  %v677_v21 = vadd.f32 %v645_v20, %v2540_v57 }
 0x1a1   : > { %v647_v62 = vmul.f32 %v615_v63, %v2588_v51  ;;  %v2642_v0 = vmul.f32 %v767_v45, %v2568_v31  ;;  %1866 = vtanh.f32 %v708_v50  ;;  %v648_v3 = vmul.f32 %v616_v32, %v2572_v26 }
 0x1a2   : > { %v678_v1 = vadd.f32 %v646_v53, %v2579_v47  ;;  %v2646_v60 = vmul.f32 %v768_v59, %v544_v9  ;;  %v709_v13 = vmul.f32 0.7978846, %v677_v21  ;;  %v617_v19 = vmul.f32 %v585_v37, %v2557_v17 }
 0x1a3   : > { %v1861_v4 = vpop.eup %1860  ;;  %v679_v41 = vadd.f32 %v647_v62, %v2588_v51  ;;  %v587_v22 = vmul.f32 0.044715, %v2610_v14  ;;  %848 = vadd.xlane.f32.xlu1 %v2642_v0  ;;  %v680_v28 = vadd.f32 %v648_v3, %v2572_v26  ;;  %v618_v10 = vmul.f32 %v586_v29, %v2599_v61 }
 0x1a4   : > { %v769_v24 = vadd.f32 1.0, %v1861_v4  ;;  %v710_v31 = vmul.f32 0.7978846, %v678_v1  ;;  %850 = vadd.xlane.f32.xlu0 %v2646_v60  ;;  %1868 = vtanh.f32 %v709_v13  ;;  %v649_v9 = vmul.f32 %v617_v19, %v2557_v17 }
 0x1a5   : > { %v711_v6 = vmul.f32 0.7978846, %v679_v41  ;;  %v589_v12 = vmul.f32 0.044715, %v2604_v5  ;;  %v712_v37 = vmul.f32 0.7978846, %v680_v28  ;;  %v650_v49 = vmul.f32 %v618_v10, %v2599_v61 }
 0x1a6   : > { %v1863_v55 = vpop.eup %1862  ;;  %v2657_v43 = vmul.f32 %v769_v24, %v545_v16  ;;  %1870 = vtanh.f32 %v710_v31  ;;  %v681_v11 = vadd.f32 %v649_v9, %v2557_v17  ;;  %v619_v20 = vmul.f32 %v587_v22, %v2610_v14 }
 0x1a7   : > { %v770_v44 = vadd.f32 1.0, %v1863_v55  ;;  %1872 = vtanh.f32 %v711_v6  ;;  %v620_v63 = vmul.f32 %v588_v2, %v2592_v39  ;;  %v547_v16 = vmul.f32 0.5, %v2544_v52 }
 0x1a8   : > { %852 = vadd.xlane.f32.xlu1 %v2657_v43  ;;  %1874 = vtanh.f32 %v712_v37  ;;  %v1865_v7 = vpop.eup %1864  ;;  %v713_v50 = vmul.f32 0.7978846, %v681_v11  ;;  %v682_v53 = vadd.f32 %v650_v49, %v2599_v61  ;;  %v651_v29 = vmul.f32 %v619_v20, %v2610_v14 }
 0x1a9   : > { %v2664_v45 = vmul.f32 %v770_v44, %v546_v40  ;;  %v771_v32 = vadd.f32 1.0, %v1865_v7  ;;  %v652_v59 = vmul.f32 %v620_v63, %v2592_v39  ;;  %v621_v21 = vmul.f32 %v589_v12, %v2604_v5 }
 0x1aa   : > { %1876 = vtanh.f32 %v713_v50  ;;  %v714_v62 = vmul.f32 0.7978846, %v682_v53  ;;  %v683_v40 = vadd.f32 %v651_v29, %v2610_v14  ;;  %v548_v4 = vmul.f32 0.5, %v2537_v54 }
 0x1ab   : > { %854 = vadd.xlane.f32.xlu0 %v2664_v45  ;;  %v1867_v2 = vpop.eup %1866  ;;  %v2672_v1 = vmul.f32 %v771_v32, %v547_v16  ;;  %v684_v52 = vadd.f32 %v652_v59, %v2592_v39  ;;  %v653_v3 = vmul.f32 %v621_v21, %v2604_v5  ;;  %v549_v6 = vmul.f32 0.5, %v2540_v57 }
 0x1ac   : > { %v772_v13 = vadd.f32 1.0, %v1867_v2  ;;  %1878 = vtanh.f32 %v714_v62  ;;  %v715_v41 = vmul.f32 0.7978846, %v683_v40  ;;  %v550_v54 = vmul.f32 0.5, %v2579_v47 }
 0x1ad   : > { %856 = vadd.xlane.f32.xlu1 %v2672_v1  ;;  %v716_v19 = vmul.f32 0.7978846, %v684_v52  ;;  %v685_v22 = vadd.f32 %v653_v3, %v2604_v5  ;;  %v551_v11 = vmul.f32 0.5, %v2588_v51  ;;  %v552_v47 = vmul.f32 0.5, %v2572_v26 }
 0x1ae   : > { %v1869_v24 = vpop.eup %1868  ;;  %v2680_v31 = vmul.f32 %v772_v13, %v548_v4  ;;  %1880 = vtanh.f32 %v715_v41  ;;  %v553_v51 = vmul.f32 0.5, %v2557_v17  ;;  %v554_v32 = vmul.f32 0.5, %v2599_v61 }
 0x1af   : > { %v773_v9 = vadd.f32 1.0, %v1869_v24  ;;  %v717_v10 = vmul.f32 0.7978846, %v685_v22  ;;  %1882 = vtanh.f32 %v716_v19  ;;  %v555_v26 = vmul.f32 0.5, %v2610_v14  ;;  %v1814_v19 = vld [vmem:[#allocation7] sm:$0xff]   ;;  %v1815_v22 = vld [vmem:[#allocation7 + $0x8] sm:$0xff]  }
 0x1b0   : > { %v1871_v28 = vpop.eup %1870  ;;  %858 = vadd.xlane.f32.xlu0 %v2680_v31  ;;  %v556_v61 = vmul.f32 0.5, %v2592_v39  ;;  %v557_v41 = vmul.f32 0.5, %v2604_v5  ;;  %1685 = vmatprep.subr.bf16.mxu1 %v1814_v19 }
 0x1b1   : > { %v1873_v55 = vpop.eup %1872  ;;  %v774_v12 = vadd.f32 1.0, %v1871_v28  ;;  %v2685_v44 = vmul.f32 %v773_v9, %v549_v6  ;;  %1884 = vtanh.f32 %v717_v10  ;;  %1686 = vmatpush3.bf16.msra.mxu1 %v1814_v19 }
 0x1b2   : > { %v1875_v37 = vpop.eup %1874  ;;  %v775_v49 = vadd.f32 1.0, %v1873_v55  ;;  %1687 = vmatprep.subr.bf16.mxu1 %v1815_v22 }
 0x1b3   : > { %v2688_v20 = vmul.f32 %v774_v12, %v550_v54  ;;  %v776_v57 = vadd.f32 1.0, %v1875_v37  ;;  %860 = vadd.xlane.f32.xlu1 %v2685_v44 }
 0x1b4   : > { %v2691_v63 = vmul.f32 %v775_v49, %v551_v11  ;;  %v1877_v7 = vpop.eup %1876 }
 0x1b5   : > { %862 = vadd.xlane.f32.xlu0 %v2688_v20  ;;  %v777_v16 = vadd.f32 1.0, %v1877_v7  ;;  %v2695_v53 = vmul.f32 %v776_v57, %v552_v47  ;;  %1688 = vmatpush3.bf16.msra.mxu1 %v1815_v22 }
 0x1b6   : > { %v1879_v50 = vpop.eup %1878 }
 0x1b7   : > { %864 = vadd.xlane.f32.xlu1 %v2691_v63  ;;  %v778_v29 = vadd.f32 1.0, %v1879_v50  ;;  %v2701_v21 = vmul.f32 %v777_v16, %v553_v51 }
 0x1b8   : > { %v1881_v59 = vpop.eup %1880 }
 0x1b9   : > { %866 = vadd.xlane.f32.xlu0 %v2695_v53  ;;  %v2703_v62 = vmul.f32 %v778_v29, %v554_v32  ;;  %v1883_v2 = vpop.eup %1882  ;;  %v779_v40 = vadd.f32 1.0, %v1881_v59 }
 0x1ba   : > { %v780_v3 = vadd.f32 1.0, %v1883_v2 }
 0x1bb   : > { %v1885_v52 = vpop.eup %1884  ;;  %868 = vadd.xlane.f32.xlu1 %v2701_v21  ;;  %v2708_v17 = vmul.f32 %v779_v40, %v555_v26 }
 0x1bc   : > { %v781_v4 = vadd.f32 1.0, %v1885_v52  ;;  %v2711_v13 = vmul.f32 %v780_v3, %v556_v61 }
 0x1bd   : > { %870 = vadd.xlane.f32.xlu0 %v2703_v62 }
 0x1be   : > { %v2716_v14 = vmul.f32 %v781_v4, %v557_v41 }
 0x1bf   : > { %872 = vadd.xlane.f32.xlu1 %v2708_v17 }
 0x1c1   : > { %874 = vadd.xlane.f32.xlu0 %v2711_v13 }
 0x1c3   : > { %876 = vadd.xlane.f32.xlu1 %v2716_v14 }
 0x209   : > { %v819_v39 = vpop.xlane.xlu1 %818 }
 0x20a   : > { %v815_v24 = vpop.xlane.xlu0 %814  ;;  %v881_v28 = vmul.f32 0.0078125, %v819_v39  ;;  %v1816_v39 = vld [vmem:[#allocation7 + $0x10] sm:$0xff]  }
 0x20b   : > { %v879_v6 = vmul.f32 0.0078125, %v815_v24  ;;  %1689 = vmatprep.subr.bf16.mxu1 %v1816_v39 }
 0x20c   : > { %v2723_v55 = vsub.f32 %v2432_v18, %v881_v28  ;;  %1690 = vmatpush3.bf16.msra.mxu1 %v1816_v39 }
 0x20d   : > { %v2720_v9 = vsub.f32 %v2435_v23, %v879_v6  ;;  %v821_v5 = vpop.xlane.xlu1 %820 }
 0x20e   : > { %v817_v10 = vpop.xlane.xlu0 %816  ;;  %v882_v54 = vmul.f32 0.0078125, %v821_v5  ;;  %v945_v7 = vmul.f32 %v2723_v55, %v2723_v55 }
 0x20f   : > { %v880_v12 = vmul.f32 0.0078125, %v817_v10  ;;  %v943_v37 = vmul.f32 %v2720_v9, %v2720_v9 }
 0x210   : > { %v2731_v57 = vsub.f32 %v2451_v34, %v882_v54 }
 0x211   : > { %v2728_v11 = vsub.f32 %v2453_v35, %v880_v12  ;;  %975 = vadd.xlane.f32.xlu0 %v943_v37 }
 0x212   : > { %v823_v49 = vpop.xlane.xlu0 %822  ;;  %v946_v32 = vmul.f32 %v2731_v57, %v2731_v57 }
 0x213   : > { %v883_v23 = vmul.f32 0.0078125, %v823_v49  ;;  %v944_v18 = vmul.f32 %v2728_v11, %v2728_v11 }
 0x214   : > { %v825_v47 = vpop.xlane.xlu1 %824 }
 0x215   : > { %v2738_v16 = vsub.f32 %v2474_v58, %v883_v23  ;;  %v884_v50 = vmul.f32 0.0078125, %v825_v47  ;;  %979 = vadd.xlane.f32.xlu0 %v945_v7  ;;  %977 = vadd.xlane.f32.xlu1 %v944_v18 }
 0x216   : > { %v827_v35 = vpop.xlane.xlu0 %826 }
 0x217   : > { %v2741_v51 = vsub.f32 %v2486_v8, %v884_v50  ;;  %v885_v34 = vmul.f32 0.0078125, %v827_v35  ;;  %v947_v29 = vmul.f32 %v2738_v16, %v2738_v16  ;;  %v1818_v50 = vld [vmem:[#allocation7 + $0x20] sm:$0xff]  }
 0x218   : > { %v829_v59 = vpop.xlane.xlu1 %828 }
 0x219   : > { %v2748_v2 = vsub.f32 %v2496_v46, %v885_v34  ;;  %v886_v58 = vmul.f32 0.0078125, %v829_v59  ;;  %981 = vadd.xlane.f32.xlu1 %v946_v32  ;;  %983 = vadd.xlane.f32.xlu0 %v947_v29  ;;  %v948_v52 = vmul.f32 %v2741_v51, %v2741_v51 }
 0x21a   : > { %v831_v26 = vpop.xlane.xlu0 %830 }
 0x21b   : > { %v2751_v40 = vsub.f32 %v2506_v25, %v886_v58  ;;  %v887_v8 = vmul.f32 0.0078125, %v831_v26  ;;  %v949_v3 = vmul.f32 %v2748_v2, %v2748_v2  ;;  %v1819_v58 = vld [vmem:[#allocation7 + $0x28] sm:$0xff]  }
 0x21d   : > { %v2758_v61 = vsub.f32 %v2515_v33, %v887_v8  ;;  %985 = vadd.xlane.f32.xlu1 %v948_v52  ;;  %987 = vadd.xlane.f32.xlu0 %v949_v3  ;;  %v950_v46 = vmul.f32 %v2751_v40, %v2751_v40 }
 0x21e   : > { %v833_v25 = vpop.xlane.xlu1 %832 }
 0x21f   : > { %v951_v4 = vmul.f32 %v2758_v61, %v2758_v61  ;;  %v888_v41 = vmul.f32 0.0078125, %v833_v25  ;;  %v835_v19 = vpop.xlane.xlu0 %834 }
 0x220   : > { %v889_v22 = vmul.f32 0.0078125, %v835_v19 }
 0x221   : > { %989 = vadd.xlane.f32.xlu1 %v950_v46  ;;  %991 = vadd.xlane.f32.xlu0 %v951_v4  ;;  %v2765_v24 = vsub.f32 %v2551_v38, %v888_v41  ;;  %v1817_v38 = vld [vmem:[#allocation7 + $0x18] sm:$0xff]   ;;  %v1820_v4 = vld [vmem:[#allocation7 + $0x30] sm:$0xff]  }
 0x222   : > { %v2768_v33 = vsub.f32 %v2554_v15, %v889_v22  ;;  %v837_v28 = vpop.xlane.xlu1 %836  ;;  %1691 = vmatprep.subr.bf16.mxu1 %v1817_v38 }
 0x223   : > { %v890_v6 = vmul.f32 0.0078125, %v837_v28  ;;  %v839_v5 = vpop.xlane.xlu0 %838  ;;  %v952_v10 = vmul.f32 %v2765_v24, %v2765_v24  ;;  %1692 = vmatpush3.bf16.msra.mxu1 %v1817_v38 }
 0x224   : > { %v891_v54 = vmul.f32 0.0078125, %v839_v5  ;;  %v953_v12 = vmul.f32 %v2768_v33, %v2768_v33  ;;  %1693 = vmatprep.subr.bf16.mxu1 %v1818_v50 }
 0x225   : > { %v2775_v37 = vsub.f32 %v2575_v36, %v890_v6  ;;  %993 = vadd.xlane.f32.xlu1 %v952_v10 }
 0x226   : > { %v2778_v15 = vsub.f32 %v2581_v48, %v891_v54  ;;  %v841_v49 = vpop.xlane.xlu1 %840  ;;  %995 = vadd.xlane.f32.xlu0 %v953_v12  ;;  %v1821_v54 = vld [vmem:[#allocation7 + $0x38] sm:$0xff]  }
 0x227   : > { %v892_v23 = vmul.f32 0.0078125, %v841_v49  ;;  %v954_v7 = vmul.f32 %v2775_v37, %v2775_v37  ;;  %1694 = vmatpush3.bf16.msra.mxu1 %v1818_v50 }
 0x228   : > { %v955_v18 = vmul.f32 %v2778_v15, %v2778_v15  ;;  %1695 = vmatprep.subr.bf16.mxu1 %v1819_v58 }
 0x229   : > { %v2785_v47 = vsub.f32 %v2596_v42, %v892_v23  ;;  %v843_v36 = vpop.xlane.xlu0 %842  ;;  %997 = vadd.xlane.f32.xlu1 %v954_v7 }
 0x22a   : > { %v893_v35 = vmul.f32 0.0078125, %v843_v36  ;;  %v845_v48 = vpop.xlane.xlu1 %844  ;;  %999 = vadd.xlane.f32.xlu0 %v955_v18 }
 0x22b   : > { %v894_v34 = vmul.f32 0.0078125, %v845_v48  ;;  %v956_v32 = vmul.f32 %v2785_v47, %v2785_v47  ;;  %1696 = vmatpush3.bf16.msra.mxu1 %v1819_v58 }
 0x22c   : > { %v2790_v29 = vsub.f32 %v2614_v27, %v893_v35  ;;  %1697 = vmatprep.subr.bf16.mxu1 %v1820_v4 }
 0x22d   : > { %v2793_v59 = vsub.f32 %v2619_v30, %v894_v34  ;;  %v847_v42 = vpop.xlane.xlu0 %846  ;;  %1001 = vadd.xlane.f32.xlu1 %v956_v32 }
 0x22e   : > { %v895_v26 = vmul.f32 0.0078125, %v847_v42  ;;  %v957_v8 = vmul.f32 %v2790_v29, %v2790_v29 }
 0x22f   : > { %v958_v52 = vmul.f32 %v2793_v59, %v2793_v59  ;;  %1698 = vmatpush3.bf16.msra.mxu1 %v1820_v4 }
 0x230   : > { %v2800_v3 = vsub.f32 %v2623_v56, %v895_v26  ;;  %v849_v27 = vpop.xlane.xlu1 %848  ;;  %1003 = vadd.xlane.f32.xlu0 %v957_v8  ;;  %1699 = vmatprep.subr.bf16.mxu1 %v1821_v54 }
 0x231   : > { %v896_v46 = vmul.f32 0.0078125, %v849_v27  ;;  %v851_v30 = vpop.xlane.xlu0 %850  ;;  %1005 = vadd.xlane.f32.xlu1 %v958_v52 }
 0x232   : > { %v897_v25 = vmul.f32 0.0078125, %v851_v30  ;;  %v959_v41 = vmul.f32 %v2800_v3, %v2800_v3 }
 0x233   : > { %v2805_v19 = vsub.f32 %v2642_v0, %v896_v46  ;;  %1700 = vmatpush3.bf16.msra.mxu1 %v1821_v54 }
 0x234   : > { %v2808_v22 = vsub.f32 %v2646_v60, %v897_v25  ;;  %1007 = vadd.xlane.f32.xlu0 %v959_v41 }
 0x235   : > { %v853_v56 = vpop.xlane.xlu1 %852  ;;  %v960_v28 = vmul.f32 %v2805_v19, %v2805_v19 }
 0x236   : > { %v898_v39 = vmul.f32 0.0078125, %v853_v56  ;;  %v961_v6 = vmul.f32 %v2808_v22, %v2808_v22 }
 0x237   : > { %1009 = vadd.xlane.f32.xlu1 %v960_v28 }
 0x238   : > { %v2815_v5 = vsub.f32 %v2657_v43, %v898_v39  ;;  %v855_v10 = vpop.xlane.xlu0 %854  ;;  %1011 = vadd.xlane.f32.xlu0 %v961_v6 }
 0x239   : > { %v899_v0 = vmul.f32 0.0078125, %v855_v10 }
 0x23a   : > { %v962_v60 = vmul.f32 %v2815_v5, %v2815_v5  ;;  %v857_v38 = vpop.xlane.xlu1 %856 }
 0x23b   : > { %v2820_v12 = vsub.f32 %v2664_v45, %v899_v0  ;;  %v900_v49 = vmul.f32 0.0078125, %v857_v38 }
 0x23c   : > { %1013 = vadd.xlane.f32.xlu1 %v962_v60 }
 0x23d   : > { %v963_v43 = vmul.f32 %v2820_v12, %v2820_v12  ;;  %v2825_v23 = vsub.f32 %v2672_v1, %v900_v49  ;;  %v859_v7 = vpop.xlane.xlu0 %858 }
 0x23e   : > { %v901_v18 = vmul.f32 0.0078125, %v859_v7 }
 0x23f   : > { %1015 = vadd.xlane.f32.xlu0 %v963_v43  ;;  %v964_v36 = vmul.f32 %v2825_v23, %v2825_v23 }
 0x240   : > { %v2830_v45 = vsub.f32 %v2680_v31, %v901_v18  ;;  %v861_v50 = vpop.xlane.xlu1 %860 }
 0x241   : > { %v902_v35 = vmul.f32 0.0078125, %v861_v50  ;;  %1017 = vadd.xlane.f32.xlu1 %v964_v36 }
 0x242   : > { %v863_v48 = vpop.xlane.xlu0 %862  ;;  %v965_v32 = vmul.f32 %v2830_v45, %v2830_v45 }
 0x243   : > { %v903_v34 = vmul.f32 0.0078125, %v863_v48  ;;  %v2835_v1 = vsub.f32 %v2685_v44, %v902_v35 }
 0x244   : > { %v865_v58 = vpop.xlane.xlu1 %864  ;;  %1019 = vadd.xlane.f32.xlu0 %v965_v32 }
 0x245   : > { %v2838_v42 = vsub.f32 %v2688_v20, %v903_v34  ;;  %v904_v26 = vmul.f32 0.0078125, %v865_v58  ;;  %v966_v31 = vmul.f32 %v2835_v1, %v2835_v1 }
 0x246   : > { %v867_v8 = vpop.xlane.xlu0 %866 }
 0x247   : > { %v905_v52 = vmul.f32 0.0078125, %v867_v8  ;;  %v967_v27 = vmul.f32 %v2838_v42, %v2838_v42  ;;  %v2845_v46 = vsub.f32 %v2691_v63, %v904_v26  ;;  %1021 = vadd.xlane.f32.xlu1 %v966_v31 }
 0x248   : > { %v869_v20 = vpop.xlane.xlu1 %868 }
 0x249   : > { %v2848_v44 = vsub.f32 %v2695_v53, %v905_v52  ;;  %1023 = vadd.xlane.f32.xlu0 %v967_v27  ;;  %v906_v30 = vmul.f32 0.0078125, %v869_v20  ;;  %v968_v25 = vmul.f32 %v2845_v46, %v2845_v46 }
 0x24a   : > { %v871_v4 = vpop.xlane.xlu0 %870 }
 0x24b   : > { %v907_v41 = vmul.f32 0.0078125, %v871_v4  ;;  %v969_v56 = vmul.f32 %v2848_v44, %v2848_v44  ;;  %v2855_v39 = vsub.f32 %v2701_v21, %v906_v30  ;;  %1025 = vadd.xlane.f32.xlu1 %v968_v25 }
 0x24c   : > { %v873_v53 = vpop.xlane.xlu1 %872 }
 0x24d   : > { %v2858_v63 = vsub.f32 %v2703_v62, %v907_v41  ;;  %1027 = vadd.xlane.f32.xlu0 %v969_v56  ;;  %v908_v28 = vmul.f32 0.0078125, %v873_v53  ;;  %v970_v10 = vmul.f32 %v2855_v39, %v2855_v39 }
 0x24e   : > { %v875_v6 = vpop.xlane.xlu0 %874 }
 0x24f   : > { %v909_v0 = vmul.f32 0.0078125, %v875_v6  ;;  %v971_v54 = vmul.f32 %v2858_v63, %v2858_v63  ;;  %v2865_v60 = vsub.f32 %v2708_v17, %v908_v28  ;;  %1029 = vadd.xlane.f32.xlu1 %v970_v10 }
 0x250   : > { %v877_v62 = vpop.xlane.xlu1 %876 }
 0x251   : > { %v2868_v21 = vsub.f32 %v2711_v13, %v909_v0  ;;  %1031 = vadd.xlane.f32.xlu0 %v971_v54  ;;  %v910_v38 = vmul.f32 0.0078125, %v877_v62  ;;  %v972_v49 = vmul.f32 %v2865_v60, %v2865_v60 }
 0x253   : > { %v973_v43 = vmul.f32 %v2868_v21, %v2868_v21  ;;  %v2875_v7 = vsub.f32 %v2716_v14, %v910_v38  ;;  %1033 = vadd.xlane.f32.xlu1 %v972_v49 }
 0x255   : > { %1035 = vadd.xlane.f32.xlu0 %v973_v43  ;;  %v974_v17 = vmul.f32 %v2875_v7, %v2875_v7 }
 0x257   : > { %1037 = vadd.xlane.f32.xlu1 %v974_v17 }
 0x29e   : > { %v976_v13 = vpop.xlane.xlu0 %975 }
 0x29f   : > { %v1039_v18 = vmul.f32 0.0078125, %v976_v13 }
 0x2a1   : > { %v1071_v36 = vadd.f32 1e-05, %v1039_v18 }
 0x2a2   : > { %v978_v50 = vpop.xlane.xlu1 %977  ;;  %v980_v35 = vpop.xlane.xlu0 %979 }
 0x2a3   : > { %v1040_v48 = vmul.f32 0.0078125, %v978_v50  ;;  %v1041_v34 = vmul.f32 0.0078125, %v980_v35  ;;  %1886 = vrsqrt.f32 %v1071_v36 }
 0x2a5   : > { %v1072_v32 = vadd.f32 1e-05, %v1040_v48  ;;  %v1073_v58 = vadd.f32 1e-05, %v1041_v34 }
 0x2a6   : > { %v982_v26 = vpop.xlane.xlu1 %981  ;;  %v984_v8 = vpop.xlane.xlu0 %983 }
 0x2a7   : > { %1888 = vrsqrt.f32 %v1072_v32  ;;  %v1042_v14 = vmul.f32 0.0078125, %v982_v26  ;;  %v1043_v31 = vmul.f32 0.0078125, %v984_v8 }
 0x2a8   : > { %1890 = vrsqrt.f32 %v1073_v58 }
 0x2a9   : > { %v1074_v52 = vadd.f32 1e-05, %v1042_v14  ;;  %v1075_v27 = vadd.f32 1e-05, %v1043_v31 }
 0x2aa   : > { %v986_v20 = vpop.xlane.xlu1 %985  ;;  %v988_v30 = vpop.xlane.xlu0 %987 }
 0x2ab   : > { %1892 = vrsqrt.f32 %v1074_v52  ;;  %v1044_v4 = vmul.f32 0.0078125, %v986_v20  ;;  %v1045_v25 = vmul.f32 0.0078125, %v988_v30 }
 0x2ac   : > { %1894 = vrsqrt.f32 %v1075_v27 }
 0x2ad   : > { %v1076_v41 = vadd.f32 1e-05, %v1044_v4  ;;  %v1077_v56 = vadd.f32 1e-05, %v1045_v25  ;;  %v1887_v6 = vpop.eup %1886 }
 0x2ae   : > { %v990_v53 = vpop.xlane.xlu1 %989  ;;  %v992_v28 = vpop.xlane.xlu0 %991  ;;  %v1135_v38 = vmul.f32 %v1887_v6, %v2720_v9 }
 0x2af   : > { %1896 = vrsqrt.f32 %v1076_v41  ;;  %v1046_v10 = vmul.f32 0.0078125, %v990_v53  ;;  %v1047_v0 = vmul.f32 0.0078125, %v992_v28 }
 0x2b0   : > { %1898 = vrsqrt.f32 %v1077_v56 }
 0x2b1   : > { %v1889_v54 = vpop.eup %1888  ;;  %v1078_v62 = vadd.f32 1e-05, %v1046_v10  ;;  %v1079_v17 = vadd.f32 1e-05, %v1047_v0 }
 0x2b2   : > { %v1136_v49 = vmul.f32 %v1889_v54, %v2728_v11  ;;  %v1891_v43 = vpop.eup %1890  ;;  %v994_v36 = vpop.xlane.xlu1 %993 }
 0x2b3   : > { %1900 = vrsqrt.f32 %v1078_v62  ;;  %v1048_v50 = vmul.f32 0.0078125, %v994_v36  ;;  %v996_v35 = vpop.xlane.xlu0 %995  ;;  %v1137_v48 = vmul.f32 %v1891_v43, %v2723_v55 }
 0x2b4   : > { %v1167_v13 = vpack.c.bf16 %v1136_v49, %v1135_v38  ;;  %v1049_v58 = vmul.f32 0.0078125, %v996_v35  ;;  %1902 = vrsqrt.f32 %v1079_v17 }
 0x2b5   : > { %v1893_v18 = vpop.eup %1892  ;;  %v1080_v26 = vadd.f32 1e-05, %v1048_v50 }
 0x2b6   : > { %1701 = vmatprep.mubr.bf16.mxu1 %v1167_v13  ;;  %v1138_v34 = vmul.f32 %v1893_v18, %v2731_v57  ;;  %v1895_v32 = vpop.eup %1894  ;;  %v1081_v11 = vadd.f32 1e-05, %v1049_v58  ;;  %v998_v14 = vpop.xlane.xlu1 %997 }
 0x2b7   : > { %1904 = vrsqrt.f32 %v1080_v26  ;;  %v1050_v31 = vmul.f32 0.0078125, %v998_v14  ;;  %v1000_v52 = vpop.xlane.xlu0 %999  ;;  %v1139_v27 = vmul.f32 %v1895_v32, %v2738_v16 }
 0x2b8   : > { %v1168_v9 = vpack.c.bf16 %v1138_v34, %v1137_v48  ;;  %v1051_v55 = vmul.f32 0.0078125, %v1000_v52  ;;  %1906 = vrsqrt.f32 %v1081_v11 }
 0x2b9   : > { %v1897_v8 = vpop.eup %1896  ;;  %v1082_v57 = vadd.f32 1e-05, %v1050_v31 }
 0x2ba   : > { %1702 = vmatmul.mubr.bf16.vlgmr.msra.gmra.mrb[0].mxu1 %v1168_v9  ;;  %v1140_v20 = vmul.f32 %v1897_v8, %v2741_v51  ;;  %v1899_v30 = vpop.eup %1898  ;;  %v1083_v41 = vadd.f32 1e-05, %v1051_v55  ;;  %v1002_v56 = vpop.xlane.xlu1 %1001 }
 0x2bb   : > { %1908 = vrsqrt.f32 %v1082_v57  ;;  %v1052_v53 = vmul.f32 0.0078125, %v1002_v56  ;;  %v1141_v28 = vmul.f32 %v1899_v30, %v2748_v2 }
 0x2bc   : > { %v1169_v4 = vpack.c.bf16 %v1140_v20, %v1139_v27  ;;  %1910 = vrsqrt.f32 %v1083_v41 }
 0x2bd   : > { %v1901_v25 = vpop.eup %1900  ;;  %v1084_v10 = vadd.f32 1e-05, %v1052_v53  ;;  %v1004_v16 = vpop.xlane.xlu0 %1003 }
 0x2be   : > { %1705 = vmatprep.mubr.bf16.mxu1 %v1169_v4  ;;  %v1142_v6 = vmul.f32 %v1901_v25, %v2751_v40  ;;  %v1053_v51 = vmul.f32 0.0078125, %v1004_v16  ;;  %v1006_v54 = vpop.xlane.xlu1 %1005  ;;  %v1903_v62 = vpop.eup %1902 }
 0x2bf   : > { %1912 = vrsqrt.f32 %v1084_v10  ;;  %v1054_v38 = vmul.f32 0.0078125, %v1006_v54  ;;  %v1143_v2 = vmul.f32 %v1903_v62, %v2758_v61 }
 0x2c0   : > { %v1170_v0 = vpack.c.bf16 %v1142_v6, %v1141_v28  ;;  %v1085_v49 = vadd.f32 1e-05, %v1053_v51 }
 0x2c1   : > { %v1905_v43 = vpop.eup %1904  ;;  %v1086_v17 = vadd.f32 1e-05, %v1054_v38  ;;  %v1008_v13 = vpop.xlane.xlu0 %1007 }
 0x2c2   : > { %1706 = vmatmul.mubr.bf16.gmra.mrb[4].mxu1 %v1170_v0  ;;  %1914 = vrsqrt.f32 %v1085_v49  ;;  %v1055_v18 = vmul.f32 0.0078125, %v1008_v13  ;;  %v1144_v40 = vmul.f32 %v1905_v43, %v2765_v24  ;;  %v1907_v36 = vpop.eup %1906 }
 0x2c3   : > { %1916 = vrsqrt.f32 %v1086_v17  ;;  %v1145_v9 = vmul.f32 %v1907_v36, %v2768_v33 }
 0x2c4   : > { %v1087_v50 = vadd.f32 1e-05, %v1055_v18  ;;  %v1010_v35 = vpop.xlane.xlu1 %1009  ;;  %v1171_v48 = vpack.c.bf16 %v1144_v40, %v1143_v2 }
 0x2c5   : > { %v1909_v34 = vpop.eup %1908  ;;  %v1056_v32 = vmul.f32 0.0078125, %v1010_v35  ;;  %v1012_v58 = vpop.xlane.xlu0 %1011 }
 0x2c6   : > { %v1057_v26 = vmul.f32 0.0078125, %v1012_v58  ;;  %1709 = vmatprep.mubr.bf16.mxu1 %v1171_v48  ;;  %v1146_v8 = vmul.f32 %v1909_v34, %v2775_v37  ;;  %v1911_v11 = vpop.eup %1910  ;;  %1918 = vrsqrt.f32 %v1087_v50 }
 0x2c7   : > { %v1088_v14 = vadd.f32 1e-05, %v1056_v32  ;;  %v1147_v20 = vmul.f32 %v1911_v11, %v2778_v15 }
 0x2c8   : > { %v1089_v61 = vadd.f32 1e-05, %v1057_v26  ;;  %v1172_v24 = vpack.c.bf16 %v1146_v8, %v1145_v9 }
 0x2c9   : > { %v1014_v31 = vpop.xlane.xlu1 %1013  ;;  %v1913_v52 = vpop.eup %1912  ;;  %1920 = vrsqrt.f32 %v1088_v14 }
 0x2ca   : > { %v1058_v27 = vmul.f32 0.0078125, %v1014_v31  ;;  %1710 = vmatmul.mubr.bf16.gmra.mrb[8].mxu1 %v1172_v24  ;;  %v1148_v30 = vmul.f32 %v1913_v52, %v2785_v47  ;;  %1922 = vrsqrt.f32 %v1089_v61 }
 0x2cc   : > { %v1090_v55 = vadd.f32 1e-05, %v1058_v27  ;;  %v1016_v57 = vpop.xlane.xlu0 %1015  ;;  %v1915_v33 = vpop.eup %1914  ;;  %v1173_v37 = vpack.c.bf16 %v1148_v30, %v1147_v20 }
 0x2cd   : > { %v1059_v4 = vmul.f32 0.0078125, %v1016_v57  ;;  %v1917_v25 = vpop.eup %1916  ;;  %v1149_v53 = vmul.f32 %v1915_v33, %v2790_v29 }
 0x2ce   : > { %1924 = vrsqrt.f32 %v1090_v55  ;;  %v1018_v56 = vpop.xlane.xlu1 %1017  ;;  %1713 = vmatprep.mubr.bf16.mxu1 %v1173_v37  ;;  %v1150_v28 = vmul.f32 %v1917_v25, %v2793_v59 }
 0x2cf   : > { %v1091_v41 = vadd.f32 1e-05, %v1059_v4  ;;  %v1060_v6 = vmul.f32 0.0078125, %v1018_v56 }
 0x2d0   : > { %v1174_v10 = vpack.c.bf16 %v1150_v28, %v1149_v53  ;;  %v1919_v15 = vpop.eup %1918 }
 0x2d1   : > { %1926 = vrsqrt.f32 %v1091_v41  ;;  %v1092_v47 = vadd.f32 1e-05, %v1060_v6  ;;  %v1020_v16 = vpop.xlane.xlu0 %1019  ;;  %v1151_v38 = vmul.f32 %v1919_v15, %v2800_v3 }
 0x2d2   : > { %v1061_v0 = vmul.f32 0.0078125, %v1020_v16  ;;  %1714 = vmatmul.mubr.bf16.gmra.mrb[12].mxu1 %v1174_v10 }
 0x2d3   : > { %v1921_v51 = vpop.eup %1920  ;;  %1928 = vrsqrt.f32 %v1092_v47 }
 0x2d4   : > { %v1093_v54 = vadd.f32 1e-05, %v1061_v0  ;;  %v1022_v62 = vpop.xlane.xlu1 %1021  ;;  %v1152_v49 = vmul.f32 %v1921_v51, %v2805_v19  ;;  %v1923_v43 = vpop.eup %1922 }
 0x2d5   : > { %v1062_v29 = vmul.f32 0.0078125, %v1022_v62  ;;  %v1153_v50 = vmul.f32 %v1923_v43, %v2808_v22 }
 0x2d6   : > { %v1024_v17 = vpop.xlane.xlu0 %1023  ;;  %v1175_v13 = vpack.c.bf16 %v1152_v49, %v1151_v38  ;;  %1930 = vrsqrt.f32 %v1093_v54 }
 0x2d7   : > { %v1063_v59 = vmul.f32 0.0078125, %v1024_v17  ;;  %v1094_v2 = vadd.f32 1e-05, %v1062_v29 }
 0x2d8   : > { %v1925_v18 = vpop.eup %1924  ;;  %v1026_v36 = vpop.xlane.xlu1 %1025  ;;  %1717 = vmatprep.mubr.bf16.mxu1 %v1175_v13 }
 0x2d9   : > { %v1095_v40 = vadd.f32 1e-05, %v1063_v59  ;;  %v1154_v35 = vmul.f32 %v1925_v18, %v2815_v5  ;;  %1932 = vrsqrt.f32 %v1094_v2  ;;  %v1064_v48 = vmul.f32 0.0078125, %v1026_v36 }
 0x2da   : > { %v1028_v3 = vpop.xlane.xlu0 %1027 }
 0x2db   : > { %v1065_v34 = vmul.f32 0.0078125, %v1028_v3  ;;  %v1176_v19 = vpack.c.bf16 %v1154_v35, %v1153_v50  ;;  %v1927_v32 = vpop.eup %1926  ;;  %1934 = vrsqrt.f32 %v1095_v40  ;;  %v1096_v58 = vadd.f32 1e-05, %v1064_v48 }
 0x2dc   : > { %v1030_v9 = vpop.xlane.xlu1 %1029  ;;  %v1155_v22 = vmul.f32 %v1927_v32, %v2820_v12 }
 0x2dd   : > { %v1097_v26 = vadd.f32 1e-05, %v1065_v34  ;;  %1718 = vmatmul.mubr.bf16.gmra.mrb[16].mxu1 %v1176_v19  ;;  %v1929_v8 = vpop.eup %1928  ;;  %1936 = vrsqrt.f32 %v1096_v58  ;;  %v1066_v11 = vmul.f32 0.0078125, %v1030_v9 }
 0x2de   : > { %v1032_v14 = vpop.xlane.xlu0 %1031  ;;  %v1156_v5 = vmul.f32 %v1929_v8, %v2825_v23 }
 0x2df   : > { %v1067_v61 = vmul.f32 0.0078125, %v1032_v14  ;;  %1938 = vrsqrt.f32 %v1097_v26  ;;  %v1098_v31 = vadd.f32 1e-05, %v1066_v11 }
 0x2e0   : > { %v1034_v52 = vpop.xlane.xlu1 %1033  ;;  %v1177_v27 = vpack.c.bf16 %v1156_v5, %v1155_v22  ;;  %v1931_v20 = vpop.eup %1930 }
 0x2e1   : > { %v1099_v24 = vadd.f32 1e-05, %v1067_v61  ;;  %1940 = vrsqrt.f32 %v1098_v31  ;;  %v1068_v30 = vmul.f32 0.0078125, %v1034_v52  ;;  %v1157_v12 = vmul.f32 %v1931_v20, %v2830_v45 }
 0x2e2   : > { %v1036_v55 = vpop.xlane.xlu0 %1035  ;;  %1721 = vmatprep.mubr.bf16.mxu1 %v1177_v27 }
 0x2e3   : > { %v1069_v57 = vmul.f32 0.0078125, %v1036_v55  ;;  %v1933_v33 = vpop.eup %1932  ;;  %1942 = vrsqrt.f32 %v1099_v24  ;;  %v1100_v4 = vadd.f32 1e-05, %v1068_v30 }
 0x2e4   : > { %v1038_v25 = vpop.xlane.xlu1 %1037  ;;  %v1158_v23 = vmul.f32 %v1933_v33, %v2835_v1 }
 0x2e5   : > { %v1101_v37 = vadd.f32 1e-05, %v1069_v57  ;;  %v1935_v41 = vpop.eup %1934  ;;  %1944 = vrsqrt.f32 %v1100_v4  ;;  %v1070_v56 = vmul.f32 0.0078125, %v1038_v25 }
 0x2e6   : > { %v1178_v53 = vpack.c.bf16 %v1158_v23, %v1157_v12  ;;  %v1159_v10 = vmul.f32 %v1935_v41, %v2838_v42 }
 0x2e7   : > { %v1937_v28 = vpop.eup %1936  ;;  %1946 = vrsqrt.f32 %v1101_v37  ;;  %v1102_v6 = vadd.f32 1e-05, %v1070_v56 }
 0x2e8   : > { %1722 = vmatmul.mubr.bf16.gmra.mrb[20].mxu1 %v1178_v53  ;;  %v1160_v15 = vmul.f32 %v1937_v28, %v2845_v46 }
 0x2e9   : > { %v1939_v47 = vpop.eup %1938  ;;  %1948 = vrsqrt.f32 %v1102_v6 }
 0x2ea   : > { %v1179_v16 = vpack.c.bf16 %v1160_v15, %v1159_v10  ;;  %v1161_v45 = vmul.f32 %v1939_v47, %v2848_v44 }
 0x2eb   : > { %v1941_v0 = vpop.eup %1940 }
 0x2ec   : > { %1725 = vmatprep.mubr.bf16.mxu1 %v1179_v16  ;;  %v1162_v1 = vmul.f32 %v1941_v0, %v2855_v39  ;;  %v2914_v39 = vld [vmem:[%s3037_s3 + $0x1] ss:$0 sm:$0xff] }
 0x2ed   : > { %v1943_v51 = vpop.eup %1942 }
 0x2ee   : > { %v1180_v54 = vpack.c.bf16 %v1162_v1, %v1161_v45  ;;  %v1163_v38 = vmul.f32 %v1943_v51, %v2858_v63 }
 0x2ef   : > { %v1945_v62 = vpop.eup %1944 }
 0x2f0   : > { %1726 = vmatmul.mubr.bf16.gmra.mrb[24].mxu1 %v1180_v54  ;;  %v1164_v42 = vmul.f32 %v1945_v62, %v2865_v60 }
 0x2f1   : > { %v1947_v49 = vpop.eup %1946 }
 0x2f2   : > { %v1181_v46 = vpack.c.bf16 %v1164_v42, %v1163_v38  ;;  %v1165_v29 = vmul.f32 %v1947_v49, %v2868_v21 }
 0x2f3   : > { %v1949_v43 = vpop.eup %1948 }
 0x2f4   : > { %1729 = vmatprep.mubr.bf16.mxu1 %v1181_v46  ;;  %v1166_v17 = vmul.f32 %v1949_v43, %v2875_v7 }
 0x2f6   : > { %v1182_v44 = vpack.c.bf16 %v1166_v17, %v1165_v29 }
 0x2f8   : > { %1730 = vmatmul.mubr.bf16.gmra.mrb[28].mxu1 %v1182_v44 }
 0x38d   : > { %v1703_v59 = vpop.f32.mrb[0].mxu1 }
 0x38e   : > { %v1295_v63 = vadd.f32 %v1703_v59, %v2914_v39  ;;  %v1286_v13 = vpop.f32.mrb[1].mxu1 }
 0x38f   : > { %v1287_v60 = vadd.f32 %v2914_v39, %v1286_v13  ;;  %v1704_v18 = vpop.f32.mrb[2].mxu1 }
 0x390   : > { %1415 = vst [vmem:[%s2920_s5 + $0x10] sm:$0xff] %v1295_v63  ;;  %v1298_v21 = vadd.f32 %v1704_v18, %v2914_v39  ;;  %v1289_v7 = vpop.f32.mrb[3].mxu1 }
 0x391   : > { %1413 = vst [vmem:[%s2920_s5] sm:$0xff] %v1287_v60  ;;  %v1290_v2 = vadd.f32 %v2914_v39, %v1289_v7 }
 0x392   : > { %1416 = vst [vmem:[%s2920_s5 + $0x18] sm:$0xff] %v1298_v21 }
 0x393   : > { %1414 = vst [vmem:[%s2920_s5 + $0x8] sm:$0xff] %v1290_v2 }
 0x395   : > { %v1707_v40 = vpop.f32.mrb[4].mxu1 }
 0x396   : > { %v1311_v36 = vadd.f32 %v1707_v40, %v2914_v39  ;;  %v1302_v50 = vpop.f32.mrb[5].mxu1 }
 0x397   : > { %v1303_v35 = vadd.f32 %v2914_v39, %v1302_v50  ;;  %v1708_v48 = vpop.f32.mrb[6].mxu1 }
 0x398   : > { %1419 = vst [vmem:[%s2920_s5 + $0x30] sm:$0xff] %v1311_v36  ;;  %v1314_v3 = vadd.f32 %v1708_v48, %v2914_v39  ;;  %v1305_v34 = vpop.f32.mrb[7].mxu1 }
 0x399   : > { %1417 = vst [vmem:[%s2920_s5 + $0x20] sm:$0xff] %v1303_v35  ;;  %v1306_v19 = vadd.f32 %v2914_v39, %v1305_v34 }
 0x39a   : > { %1420 = vst [vmem:[%s2920_s5 + $0x38] sm:$0xff] %v1314_v3 }
 0x39b   : > { %1418 = vst [vmem:[%s2920_s5 + $0x28] sm:$0xff] %v1306_v19 }
 0x39d   : > { %v1711_v32 = vpop.f32.mrb[8].mxu1 }
 0x39e   : > { %v1327_v58 = vadd.f32 %v1711_v32, %v2914_v39  ;;  %v1318_v26 = vpop.f32.mrb[9].mxu1 }
 0x39f   : > { %v1319_v9 = vadd.f32 %v2914_v39, %v1318_v26  ;;  %v1712_v8 = vpop.f32.mrb[10].mxu1 }
 0x3a0   : > { %1423 = vst [vmem:[%s2920_s5 + $0x50] sm:$0xff] %v1327_v58  ;;  %v1330_v11 = vadd.f32 %v1712_v8, %v2914_v39  ;;  %v1321_v14 = vpop.f32.mrb[11].mxu1 }
 0x3a1   : > { %1421 = vst [vmem:[%s2920_s5 + $0x40] sm:$0xff] %v1319_v9  ;;  %v1322_v61 = vadd.f32 %v2914_v39, %v1321_v14 }
 0x3a2   : > { %1424 = vst [vmem:[%s2920_s5 + $0x58] sm:$0xff] %v1330_v11 }
 0x3a3   : > { %1422 = vst [vmem:[%s2920_s5 + $0x48] sm:$0xff] %v1322_v61 }
 0x3a5   : > { %v1715_v22 = vpop.f32.mrb[12].mxu1 }
 0x3a6   : > { %v1343_v5 = vadd.f32 %v1715_v22, %v2914_v39  ;;  %v1334_v31 = vpop.f32.mrb[13].mxu1 }
 0x3a7   : > { %v1335_v24 = vadd.f32 %v2914_v39, %v1334_v31  ;;  %v1716_v52 = vpop.f32.mrb[14].mxu1 }
 0x3a8   : > { %1427 = vst [vmem:[%s2920_s5 + $0x70] sm:$0xff] %v1343_v5  ;;  %v1346_v27 = vadd.f32 %v1716_v52, %v2914_v39  ;;  %v1337_v20 = vpop.f32.mrb[15].mxu1 }
 0x3a9   : > { %1425 = vst [vmem:[%s2920_s5 + $0x60] sm:$0xff] %v1335_v24  ;;  %v1338_v30 = vadd.f32 %v2914_v39, %v1337_v20 }
 0x3aa   : > { %1428 = vst [vmem:[%s2920_s5 + $0x78] sm:$0xff] %v1346_v27 }
 0x3ab   : > { %1426 = vst [vmem:[%s2920_s5 + $0x68] sm:$0xff] %v1338_v30 }
 0x3b0   : > { %v1719_v55 = vpop.f32.mrb[16].mxu1 }
 0x3b1   : > { %v1359_v57 = vadd.f32 %v1719_v55, %v2914_v39  ;;  %v1350_v33 = vpop.f32.mrb[17].mxu1 }
 0x3b2   : > { %v1351_v4 = vadd.f32 %v2914_v39, %v1350_v33  ;;  %v1720_v37 = vpop.f32.mrb[18].mxu1 }
 0x3b3   : > { %1431 = vst [vmem:[%s2920_s5 + $0x90] sm:$0xff] %v1359_v57  ;;  %v1362_v25 = vadd.f32 %v1720_v37, %v2914_v39  ;;  %v1353_v12 = vpop.f32.mrb[19].mxu1 }
 0x3b4   : > { %1429 = vst [vmem:[%s2920_s5 + $0x80] sm:$0xff] %v1351_v4  ;;  %v1354_v23 = vadd.f32 %v2914_v39, %v1353_v12 }
 0x3b5   : > { %1432 = vst [vmem:[%s2920_s5 + $0x98] sm:$0xff] %v1362_v25 }
 0x3b6   : > { %1430 = vst [vmem:[%s2920_s5 + $0x88] sm:$0xff] %v1354_v23 }
 0x3bb   : > { %v1723_v41 = vpop.f32.mrb[20].mxu1 }
 0x3bc   : > { %v1375_v56 = vadd.f32 %v1723_v41, %v2914_v39  ;;  %v1366_v53 = vpop.f32.mrb[21].mxu1 }
 0x3bd   : > { %v1367_v28 = vadd.f32 %v2914_v39, %v1366_v53  ;;  %v1724_v6 = vpop.f32.mrb[22].mxu1 }
 0x3be   : > { %1435 = vst [vmem:[%s2920_s5 + $0xb0] sm:$0xff] %v1375_v56  ;;  %v1378_v10 = vadd.f32 %v1724_v6, %v2914_v39  ;;  %v1369_v15 = vpop.f32.mrb[23].mxu1 }
 0x3bf   : > { %1433 = vst [vmem:[%s2920_s5 + $0xa0] sm:$0xff] %v1367_v28  ;;  %v1370_v47 = vadd.f32 %v2914_v39, %v1369_v15 }
 0x3c0   : > { %1436 = vst [vmem:[%s2920_s5 + $0xb8] sm:$0xff] %v1378_v10 }
 0x3c1   : > { %1434 = vst [vmem:[%s2920_s5 + $0xa8] sm:$0xff] %v1370_v47 }
 0x3c3   : > { %v1727_v16 = vpop.f32.mrb[24].mxu1 }
 0x3c4   : > { %v1391_v0 = vadd.f32 %v1727_v16, %v2914_v39  ;;  %v1382_v45 = vpop.f32.mrb[25].mxu1 }
 0x3c5   : > { %v1383_v1 = vadd.f32 %v2914_v39, %v1382_v45  ;;  %v1728_v51 = vpop.f32.mrb[26].mxu1 }
 0x3c6   : > { %1439 = vst [vmem:[%s2920_s5 + $0xd0] sm:$0xff] %v1391_v0  ;;  %v1394_v54 = vadd.f32 %v1728_v51, %v2914_v39  ;;  %v1385_v62 = vpop.f32.mrb[27].mxu1 }
 0x3c7   : > { %1437 = vst [vmem:[%s2920_s5 + $0xc0] sm:$0xff] %v1383_v1  ;;  %v1386_v38 = vadd.f32 %v2914_v39, %v1385_v62 }
 0x3c8   : > { %1440 = vst [vmem:[%s2920_s5 + $0xd8] sm:$0xff] %v1394_v54 }
 0x3c9   : > { %1438 = vst [vmem:[%s2920_s5 + $0xc8] sm:$0xff] %v1386_v38 }
 0x3cb   : > { %v1731_v42 = vpop.f32.mrb[28].mxu1 }
 0x3cc   : > { %v1407_v49 = vadd.f32 %v1731_v42, %v2914_v39  ;;  %v1398_v46 = vpop.f32.mrb[29].mxu1 }
 0x3cd   : > { %v1399_v43 = vadd.f32 %v2914_v39, %v1398_v46  ;;  %v1732_v29 = vpop.f32.mrb[30].mxu1 }
 0x3ce   : > { %1443 = vst [vmem:[%s2920_s5 + $0xf0] sm:$0xff] %v1407_v49  ;;  %v1410_v17 = vadd.f32 %v1732_v29, %v2914_v39  ;;  %v1401_v44 = vpop.f32.mrb[31].mxu1 }
 0x3cf   : > { %1441 = vst [vmem:[%s2920_s5 + $0xe0] sm:$0xff] %v1399_v43  ;;  %v1402_v59 = vadd.f32 %v2914_v39, %v1401_v44 }
 0x3d0   : > { %1444 = vst [vmem:[%s2920_s5 + $0xf8] sm:$0xff] %v1410_v17 }
 0x3d1   : > { %1442 = vst [vmem:[%s2920_s5 + $0xe8] sm:$0xff] %v1402_v59 }
 0x3d2   : > { %2049 = shalt.err (!%p2046_p7)
}
 0x3d3   : > { %s2050_s26 = scalar_lea.hbm %s2985_s11, 4096  ;;  %s2054_s23 = scalar_lea.hbm %s3038_s4, 16384 }
 0x3d4   : > { %p2051_p9 = scmp.ne.s32.totalorder %s2985_s11, %s2050_s26  ;;  %p2055_p5 = scmp.lt.u32.totalorder %s2985_s11, %s3038_s4 }
 0x3d5   : > { %p2056_p10 = scmp.lt.u32.totalorder %s2054_s23, %s2050_s26  ;;  %p2058_p1 = scmp.lt.u32.totalorder %s2050_s26, %s2985_s11 }
 0x3d6   : > { %p2052_p12 = pnand %p2051_p9, %p2255_p4 }
 0x3d7   : > { %p2057_p11 = por %p2056_p10, %p2055_p5 }
 0x3d8   : > { %p2053_p0 = pneg %p2052_p12 }
 0x3d9   : > { %p2059_p2 = por %p2058_p1, %p2057_p11 }
 0x3db   : > { %p2060_p6 = pnand %p2059_p2, %p2053_p0 }
 0x3dd   : > { %2063 = shalt.err (!%p2060_p6)
}
 0x3de   : > { %s2116_s5 = smov 128   ;;  %s2117_s6 = smov 8  }
 0x3df   : > { %1743 = dma.vmem_to_hbm [thread:$0]  (%p2255_p4), %s2987_s24, 4096, %s2985_s11, %s1446_s19, %s2116_s5, %s2116_s5, %s2117_s6  }
 0x3e0 PF: > { %p1765_p8 = scmp.ge.s32.totalorder %s2106_s18, 2  ;;  %s1474_s20 = sand.u32 1, %s2094_s15  }
 0x3e1   : > { %p3053_p13 = scmp.ne.s32.totalorder %s3043_s22, 0  ;;  %s1475_s28 = scalar_lea.sflag [#allocation4], %s1474_s20 }
 0x3e3   : > { %p1757_p3 = pnand %p1765_p8, %p3053_p13 }
 0x3e5   : > { %2089 = dma.done.wait (!%p1757_p3), %s1475_s28, 4096  }
 0x3e6   : > { %2091 = vsyncadd (!%p1757_p3), %s1475_s28, 4294963200  ;;  %p18_p7 = scmp.ge.s32.totalorder %s2245_s9, 6   ;;  %s3054_s15 = smov %s2098_s16 }
 0x3e7   : > { %s3055_s16 = smov %s2102_s17  ;;  %s3056_s17 = smov %s2261_s14 }
 0x3e8   : > { %s3057_s18 = smov %s2245_s9  ;;  %20 = sbr.rel (!%p18_p7) target bundleno = 6 (0x6), region = 89 }
 0x3ef   :  { %1480 = vsyncpa [#allocation3], 1 }
 0x3f0   :  { %1482 = vsyncpa [#allocation3 + $0x1], 1 }
 0x3f1   :  { %1483 = vsyncpa [#allocation6], 1 }
 0x3f2   :  { %1484 = vsyncpa [#allocation4], 1 }
 0x3f3   :  { %1486 = vsyncpa [#allocation4 + $0x1], 1 }

</bundles_post_ra>
